<compile_context>
chip_gen: v6e
topology: v6e:2x2x1
jax: 0.10.0
libtpu: 0.0.40
codegen_flags: <defaults>
</compile_context>

<pallas_src>
import functools
import math

import jax
import jax.numpy as jnp
from jax import lax
from jax.experimental import pallas as pl
from jax.experimental.pallas import tpu as pltpu

# ---------------- config (small synthetic shapes) ----------------
B, S = 2, 16           # batch, sequence
H = 32                 # hidden_size
NH = 4                 # num_attention_heads
HD = H // NH           # head dim
INTER = 64             # intermediate_size
NLAYERS = 2            # num_hidden_layers
VOCAB = 64             # vocab_size
MAXPOS = 32            # max_position_embeddings
NUM_LABELS = 2
LN_EPS = 1e-5


# ---------------- in-kernel helpers ----------------
def _layernorm(x, g, b, eps=LN_EPS):
    x = x.astype(jnp.float32)
    mu = jnp.mean(x, axis=-1, keepdims=True)
    var = jnp.mean(jnp.square(x - mu), axis=-1, keepdims=True)
    return (x - mu) * lax.rsqrt(var + eps) * g + b


def _gelu_tanh(x):
    # TODO(synk): HF RoBERTa uses exact erf-GELU; erf has no guaranteed Mosaic
    # lowering, so the tanh approximation is used in-kernel (max abs err ~3e-4).
    c = 0.7978845608028654  # sqrt(2/pi)
    return 0.5 * x * (1.0 + jnp.tanh(c * (x + 0.044715 * x * x * x)))


# ---------------- fused encoder kernel ----------------
def _encoder_kernel(nodes_ref, token_ref, attn_ref, word_ref, postok_ref,
                    embg_ref, embb_ref,
                    wqkv_ref, bqkv_ref, wo_ref, bo_ref, ln1g_ref, ln1b_ref,
                    wi_ref, bi_ref, wo2_ref, bo2_ref, ln2g_ref, ln2b_ref,
                    out_ref,
                    x_sc, qkv_sc, ao_sc, bias_sc,
                    *, batch, seq, hidden, n_heads):
    head_dim = hidden // n_heads
    scale = 1.0 / math.sqrt(head_dim)
    layer = pl.program_id(0)
    last_layer = pl.num_programs(0) - 1

    # ---- layer-0 prologue: graph node->token mixing + embeddings + LayerNorm
    #      and the additive attention bias (built once, reused by every layer)
    @pl.when(layer == 0)
    def _embed():
        for bb in range(batch):
            nodes_b = nodes_ref[bb]          # (S, 1)  0/1
            token_b = token_ref[bb]          # (1, S)  0/1
            attn_b = attn_ref[bb]            # (S, S)  0/1
            word_b = word_ref[bb]            # (S, H)
            row0 = bb * seq

            # additive mask bias: 0 where attended, -1e9 where masked
            bias_sc[pl.ds(row0, seq), :] = (attn_b - 1.0) * 1e9

            ntm = nodes_b * token_b * attn_b
            denom = jnp.sum(ntm, axis=-1, keepdims=True) + 1e-10
            ntm = ntm * pl.reciprocal(denom, approx=True)
            avg = jnp.dot(ntm, word_b, preferred_element_type=jnp.float32)
            mixed = word_b * (1.0 - nodes_b) + avg * nodes_b
            emb_b = mixed + postok_ref[bb]
            x_sc[pl.ds(row0, seq), :] = _layernorm(
                emb_b, embg_ref[...], embb_ref[...])

    # ---- transformer layer `layer` (runs every grid step) ----
    x = x_sc[...]                                                   # (B*S, H)

    # fused QKV projection (one MXU pass, x read once)
    qkv_sc[...] = (jnp.dot(x, wqkv_ref[0],
                           preferred_element_type=jnp.float32) + bqkv_ref[0])

    wo = wo_ref[0]                                                  # (H, H)
    for bb in range(batch):
        row0 = bb * seq
        bias_b = bias_sc[pl.ds(row0, seq), :]                       # (S, S)
        acc = jnp.zeros((seq, hidden), jnp.float32)
        for hh in range(n_heads):
            # fold 1/sqrt(d) into the (S, HD) q read (cheaper than scaling (S, S))
            qh = qkv_sc[pl.ds(row0, seq), pl.ds(hh * head_dim, head_dim)] * scale
            kh = qkv_sc[pl.ds(row0, seq), pl.ds(hidden + hh * head_dim, head_dim)]
            vh = qkv_sc[pl.ds(row0, seq), pl.ds(2 * hidden + hh * head_dim, head_dim)]
            # q @ k^T without an explicit transpose
            s = lax.dot_general(qh, kh, (((1,), (1,)), ((), ())),
                                preferred_element_type=jnp.float32)
            s = s + bias_b
            s = s - jnp.max(s, axis=-1, keepdims=True)
            p = jnp.exp(s)
            p = p * pl.reciprocal(jnp.sum(p, axis=-1, keepdims=True), approx=True)
            ctx_h = jnp.dot(p, vh, preferred_element_type=jnp.float32)  # (S, HD)
            # fold output projection per head: ctx @ Wo == sum_h ctx_h @ Wo[h]
            acc = acc + jnp.dot(ctx_h,
                                wo[hh * head_dim:(hh + 1) * head_dim, :],
                                preferred_element_type=jnp.float32)
        ao_sc[pl.ds(row0, seq), :] = acc + bo_ref[0]

    # residual + LayerNorm epilogue (attention block)
    x = _layernorm(x + ao_sc[...], ln1g_ref[0], ln1b_ref[0])

    # feed-forward with fused GELU epilogue, then residual + LayerNorm
    hmid = _gelu_tanh(jnp.dot(x, wi_ref[0],
                              preferred_element_type=jnp.float32) + bi_ref[0])
    ffn = jnp.dot(hmid, wo2_ref[0], preferred_element_type=jnp.float32) + bo2_ref[0]
    x = _layernorm(x + ffn, ln2g_ref[0], ln2b_ref[0])

    x_sc[...] = x

    # output block is VMEM-resident across the layer axis: store once
    @pl.when(layer == last_layer)
    def _store():
        out_ref[...] = x.astype(out_ref.dtype)


def _const_spec(shape):
    nd = len(shape)
    return pl.BlockSpec(shape, lambda *_: (0,) * nd)


def _stacked_spec(shape):
    # (L, a, b) weights: pick layer `l`'s (a, b) slab each grid step
    return pl.BlockSpec((1,) + tuple(shape[1:]), lambda l: (l, 0, 0))


def _build_encoder_call(batch, seq, hidden, n_heads, inter, n_layers, dtype):
    kernel = functools.partial(_encoder_kernel, batch=batch, seq=seq,
                               hidden=hidden, n_heads=n_heads)
    in_specs = [
        _const_spec((batch, seq, 1)),                    # nodes mask
        _const_spec((batch, 1, seq)),                    # token mask
        _const_spec((batch, seq, seq)),                  # attention mask
        _const_spec((batch, seq, hidden)),               # word embeddings
        _const_spec((batch, seq, hidden)),               # pos + token_type embeddings
        _const_spec((1, hidden)),                        # emb LN gamma
        _const_spec((1, hidden)),                        # emb LN beta
        _stacked_spec((n_layers, hidden, 3 * hidden)),   # fused Wqkv
        _stacked_spec((n_layers, 1, 3 * hidden)),        # fused bqkv
        _stacked_spec((n_layers, hidden, hidden)),       # Wo
        _stacked_spec((n_layers, 1, hidden)),            # bo
        _stacked_spec((n_layers, 1, hidden)),            # LN1 gamma
        _stacked_spec((n_layers, 1, hidden)),            # LN1 beta
        _stacked_spec((n_layers, hidden, inter)),        # Wi
        _stacked_spec((n_layers, 1, inter)),             # bi
        _stacked_spec((n_layers, inter, hidden)),        # Wo2
        _stacked_spec((n_layers, 1, hidden)),            # bo2
        _stacked_spec((n_layers, 1, hidden)),            # LN2 gamma
        _stacked_spec((n_layers, 1, hidden)),            # LN2 beta
    ]
    return pl.pallas_call(
        kernel,
        out_shape=jax.ShapeDtypeStruct((batch * seq, hidden), dtype),
        grid_spec=pltpu.PrefetchScalarGridSpec(
            num_scalar_prefetch=0,
            grid=(n_layers,),
            in_specs=in_specs,
            out_specs=pl.BlockSpec((batch * seq, hidden), lambda l: (0, 0)),
            scratch_shapes=[
                pltpu.VMEM((batch * seq, hidden), jnp.float32),      # resident x
                pltpu.VMEM((batch * seq, 3 * hidden), jnp.float32),  # fused qkv
                pltpu.VMEM((batch * seq, hidden), jnp.float32),      # attn output
                pltpu.VMEM((batch * seq, seq), jnp.float32),         # additive bias
            ]),
        compiler_params=pltpu.CompilerParams(
            dimension_semantics=("arbitrary",)),
    )


# ---------------- parameter init (deterministic, synthetic) ----------------
def init_params(key):
    keys = iter(jax.random.split(key, 8))

    def nrm(shape):
        return 0.02 * jax.random.normal(next(keys), shape, jnp.float32)

    return dict(
        word_emb=nrm((VOCAB, H)),
        pos_emb=nrm((MAXPOS, H)),
        tok_emb=nrm((2, H)),
        emb_ln_g=jnp.ones((1, H), jnp.float32),
        emb_ln_b=jnp.zeros((1, H), jnp.float32),
        wqkv=nrm((NLAYERS, H, 3 * H)),
        bqkv=jnp.zeros((NLAYERS, 1, 3 * H), jnp.float32),
        wo=nrm((NLAYERS, H, H)),
        bo=jnp.zeros((NLAYERS, 1, H), jnp.float32),
        ln1_g=jnp.ones((NLAYERS, 1, H), jnp.float32),
        ln1_b=jnp.zeros((NLAYERS, 1, H), jnp.float32),
        wi=nrm((NLAYERS, H, INTER)),
        bi=jnp.zeros((NLAYERS, 1, INTER), jnp.float32),
        wo2=nrm((NLAYERS, INTER, H)),
        bo2=jnp.zeros((NLAYERS, 1, H), jnp.float32),
        ln2_g=jnp.ones((NLAYERS, 1, H), jnp.float32),
        ln2_b=jnp.zeros((NLAYERS, 1, H), jnp.float32),
        cls_w=nrm((H, NUM_LABELS)),
        cls_b=jnp.zeros((NUM_LABELS,), jnp.float32),
    )


# ---------------- forward pass ----------------
def graphcodebert_forward(params, inputs_ids, position_idx, attn_mask):
    if inputs_ids.ndim == 1:
        inputs_ids = inputs_ids[None]
        position_idx = position_idx[None]
        attn_mask = attn_mask[None]

    batch, seq = inputs_ids.shape
    hidden = params["word_emb"].shape[1]
    n_layers, _, inter = params["wi"].shape

    attn_f = attn_mask.astype(jnp.float32)                            # (B,S,S)
    nodes_f = (position_idx == 0).astype(jnp.float32)[:, :, None]     # (B,S,1)
    token_f = (position_idx >= 2).astype(jnp.float32)[:, None, :]     # (B,1,S)

    # embedding-table gathers stay in XLA glue (data-dependent lookups)
    word = jnp.take(params["word_emb"], inputs_ids, axis=0)           # (B,S,H)
    token_type_ids = (position_idx == -1).astype(jnp.int32)
    pos_tok = (jnp.take(params["pos_emb"], position_idx, axis=0)
               + jnp.take(params["tok_emb"], token_type_ids, axis=0))

    call = _build_encoder_call(batch, seq, hidden, NH, inter, n_layers,
                               word.dtype)
    out_flat = call(nodes_f, token_f, attn_f, word, pos_tok,
                    params["emb_ln_g"], params["emb_ln_b"],
                    params["wqkv"], params["bqkv"], params["wo"], params["bo"],
                    params["ln1_g"], params["ln1_b"],
                    params["wi"], params["bi"], params["wo2"], params["bo2"],
                    params["ln2_g"], params["ln2_b"])
    outputs = out_flat.reshape(batch, seq, hidden)

    # RobertaClassificationHead per spec: Linear(H -> num_labels) then tanh.
    # ~128 FLOPs -> plain JAX (a dedicated kernel would be pure launch cost).
    cls = outputs[:, 0, :]
    logits = jnp.tanh(cls @ params["cls_w"] + params["cls_b"])
    return outputs, logits


# ---------------- pure-JAX reference (for a sanity cross-check) ----------------
def reference_forward(params, inputs_ids, position_idx, attn_mask):
    hp = jax.lax.Precision.HIGHEST
    batch, seq = inputs_ids.shape
    attn_f = attn_mask.astype(jnp.float32)
    nodes = (position_idx == 0).astype(jnp.float32)
    token = (position_idx >= 2).astype(jnp.float32)
    word = jnp.take(params["word_emb"], inputs_ids, axis=0)
    ntm = nodes[:, :, None] * token[:, None, :] * attn_f
    ntm = ntm / (ntm.sum(-1, keepdims=True) + 1e-10)
    avg = jnp.einsum('abc,acd->abd', ntm, word, precision=hp)
    emb = word * (1.0 - nodes)[:, :, None] + avg * nodes[:, :, None]
    tok_type = (position_idx == -1).astype(jnp.int32)
    x = (emb + jnp.take(params["pos_emb"], position_idx, axis=0)
         + jnp.take(params["tok_emb"], tok_type, axis=0))

    def ln(v, g, b):
        mu = v.mean(-1, keepdims=True)
        var = ((v - mu) ** 2).mean(-1, keepdims=True)
        return (v - mu) * jax.lax.rsqrt(var + LN_EPS) * g + b

    x = ln(x, params["emb_ln_g"][0], params["emb_ln_b"][0])
    bias = (1.0 - attn_f)[:, None, :, :] * 1e9 * -1.0
    for l in range(NLAYERS):
        qkv = jnp.einsum('bsh,hk->bsk', x, params["wqkv"][l], precision=hp) \
            + params["bqkv"][l][0]
        q, k, v = jnp.split(qkv, 3, axis=-1)
        heads = lambda t: t.reshape(batch, seq, NH, HD).transpose(0, 2, 1, 3)
        q, k, v = heads(q), heads(k), heads(v)
        s = jnp.einsum('bhqd,bhkd->bhqk', q, k, precision=hp) / math.sqrt(HD) + bias
        p = jax.nn.softmax(s, axis=-1)
        ctx = jnp.einsum('bhqk,bhkd->bhqd', p, v, precision=hp)
        ctx = ctx.transpose(0, 2, 1, 3).reshape(batch, seq, H)
        attn_out = jnp.einsum('bsh,hk->bsk', ctx, params["wo"][l], precision=hp) \
            + params["bo"][l][0]
        x = ln(x + attn_out, params["ln1_g"][l][0], params["ln1_b"][l][0])
        hmid = _gelu_tanh(jnp.einsum('bsh,hk->bsk', x, params["wi"][l],
                                     precision=hp) + params["bi"][l][0])
        ffn = jnp.einsum('bsk,kh->bsh', hmid, params["wo2"][l], precision=hp) \
            + params["bo2"][l][0]
        x = ln(x + ffn, params["ln2_g"][l][0], params["ln2_b"][l][0])
    cls = x[:, 0, :]
    logits = jnp.tanh(cls @ params["cls_w"] + params["cls_b"])
    return x, logits


# ---------------- main ----------------
if __name__ == "__main__":
    key = jax.random.PRNGKey(0)
    pkey, ikey = jax.random.split(key)
    params = init_params(pkey)

    # deterministic synthetic inputs
    inputs_ids = jax.random.randint(ikey, (B, S), 0, VOCAB, dtype=jnp.int32)
    # positions: 10 code tokens (pos 2..11), 4 DFG nodes (pos 0), 2 padding (pos 1)
    row = [2 + s for s in range(10)] + [0] * 4 + [1] * 2
    position_idx = jnp.array([row, row], dtype=jnp.int32)
    valid = (position_idx != 1)
    attn_mask = valid[:, :, None] & valid[:, None, :]                 # (B,S,S) bool

    fwd = jax.jit(graphcodebert_forward)
    outputs, logits = fwd(params, inputs_ids, position_idx, attn_mask)
    outputs = jax.block_until_ready(outputs)
    logits = jax.block_until_ready(logits)

    assert outputs.shape == (B, S, H) and logits.shape == (B, NUM_LABELS)
    assert bool(jnp.all(jnp.isfinite(outputs))) and bool(jnp.all(jnp.isfinite(logits)))

    # sanity cross-check against a pure-JAX reference (same gelu approximation;
    # expected deltas come only from approx-reciprocal softmax / matmul precision)
    ref_out, ref_logits = reference_forward(params, inputs_ids, position_idx, attn_mask)
    assert float(jnp.max(jnp.abs(outputs - ref_out))) < 5e-2
    assert float(jnp.max(jnp.abs(logits - ref_logits))) < 5e-2

    print("KERNEL_OK")
</pallas_src>

<mosaic_0001>
module attributes {stable_mosaic.version = 11 : i64} {
  func.func @_encoder_kernel(%arg0: i32, %arg1: memref<2x16x1xf32, #tpu.memory_space<vmem>>, %arg2: memref<2x1x16xf32, #tpu.memory_space<vmem>>, %arg3: memref<2x16x16xf32, #tpu.memory_space<vmem>>, %arg4: memref<2x16x32xf32, #tpu.memory_space<vmem>>, %arg5: memref<2x16x32xf32, #tpu.memory_space<vmem>>, %arg6: memref<1x32xf32, #tpu.memory_space<vmem>>, %arg7: memref<1x32xf32, #tpu.memory_space<vmem>>, %arg8: memref<1x32x96xf32, #tpu.memory_space<vmem>>, %arg9: memref<1x1x96xf32, #tpu.memory_space<vmem>>, %arg10: memref<1x32x32xf32, #tpu.memory_space<vmem>>, %arg11: memref<1x1x32xf32, #tpu.memory_space<vmem>>, %arg12: memref<1x1x32xf32, #tpu.memory_space<vmem>>, %arg13: memref<1x1x32xf32, #tpu.memory_space<vmem>>, %arg14: memref<1x32x64xf32, #tpu.memory_space<vmem>>, %arg15: memref<1x1x64xf32, #tpu.memory_space<vmem>>, %arg16: memref<1x64x32xf32, #tpu.memory_space<vmem>>, %arg17: memref<1x1x32xf32, #tpu.memory_space<vmem>>, %arg18: memref<1x1x32xf32, #tpu.memory_space<vmem>>, %arg19: memref<1x1x32xf32, #tpu.memory_space<vmem>>, %arg20: memref<32x32xf32, #tpu.memory_space<vmem>>, %arg21: memref<32x32xf32, #tpu.memory_space<vmem>>, %arg22: memref<32x96xf32, #tpu.memory_space<vmem>>, %arg23: memref<32x32xf32, #tpu.memory_space<vmem>>, %arg24: memref<32x16xf32, #tpu.memory_space<vmem>>) attributes {dimension_semantics = [#tpu.dimension_semantics<arbitrary>], iteration_bounds = array<i64: 2>, scalar_prefetch = 0 : i64, scratch_operands = 4 : i64, tpu.core_type = #tpu.core_type<tc>, window_params = [{pipeline_mode = #tpu.pipeline_mode<synchronous>, transform_indices = @transform_0, window_bounds = array<i64: 2, 16, 1>}, {pipeline_mode = #tpu.pipeline_mode<synchronous>, transform_indices = @transform_1, window_bounds = array<i64: 2, 1, 16>}, {pipeline_mode = #tpu.pipeline_mode<synchronous>, transform_indices = @transform_2, window_bounds = array<i64: 2, 16, 16>}, {pipeline_mode = #tpu.pipeline_mode<synchronous>, transform_indices = @transform_3, window_bounds = array<i64: 2, 16, 32>}, {pipeline_mode = #tpu.pipeline_mode<synchronous>, transform_indices = @transform_4, window_bounds = array<i64: 2, 16, 32>}, {pipeline_mode = #tpu.pipeline_mode<synchronous>, transform_indices = @transform_5, window_bounds = array<i64: 1, 32>}, {pipeline_mode = #tpu.pipeline_mode<synchronous>, transform_indices = @transform_6, window_bounds = array<i64: 1, 32>}, {transform_indices = @transform_7, window_bounds = array<i64: 1, 32, 96>}, {transform_indices = @transform_8, window_bounds = array<i64: 1, 1, 96>}, {transform_indices = @transform_9, window_bounds = array<i64: 1, 32, 32>}, {transform_indices = @transform_10, window_bounds = array<i64: 1, 1, 32>}, {transform_indices = @transform_11, window_bounds = array<i64: 1, 1, 32>}, {transform_indices = @transform_12, window_bounds = array<i64: 1, 1, 32>}, {transform_indices = @transform_13, window_bounds = array<i64: 1, 32, 64>}, {transform_indices = @transform_14, window_bounds = array<i64: 1, 1, 64>}, {transform_indices = @transform_15, window_bounds = array<i64: 1, 64, 32>}, {transform_indices = @transform_16, window_bounds = array<i64: 1, 1, 32>}, {transform_indices = @transform_17, window_bounds = array<i64: 1, 1, 32>}, {transform_indices = @transform_18, window_bounds = array<i64: 1, 1, 32>}, {pipeline_mode = #tpu.pipeline_mode<synchronous>, transform_indices = @transform_19, window_bounds = array<i64: 32, 32>}]} {
    %c0_i32 = arith.constant 0 : i32
    %0 = arith.cmpi eq, %arg0, %c0_i32 : i32
    %1 = arith.extui %0 : i1 to i32
    %c0_i32_0 = arith.constant 0 : i32
    %2 = arith.cmpi ne, %1, %c0_i32_0 : i32
    scf.if %2 {
      %c0_159 = arith.constant 0 : index
      %c0_160 = arith.constant 0 : index
      %c0_161 = arith.constant 0 : index
      %282 = vector.load %arg1[%c0_159, %c0_160, %c0_161] : memref<2x16x1xf32, #tpu.memory_space<vmem>>, vector<1x16x1xf32>
      %283 = vector.shape_cast %282 : vector<1x16x1xf32> to vector<16x1xf32>
      %c0_162 = arith.constant 0 : index
      %c0_163 = arith.constant 0 : index
      %c0_164 = arith.constant 0 : index
      %284 = vector.load %arg2[%c0_162, %c0_163, %c0_164] : memref<2x1x16xf32, #tpu.memory_space<vmem>>, vector<1x1x16xf32>
      %285 = vector.shape_cast %284 : vector<1x1x16xf32> to vector<1x16xf32>
      %c0_165 = arith.constant 0 : index
      %c0_166 = arith.constant 0 : index
      %c0_167 = arith.constant 0 : index
      %286 = vector.load %arg3[%c0_165, %c0_166, %c0_167] : memref<2x16x16xf32, #tpu.memory_space<vmem>>, vector<1x16x16xf32>
      %287 = vector.shape_cast %286 : vector<1x16x16xf32> to vector<16x16xf32>
      %c0_168 = arith.constant 0 : index
      %c0_169 = arith.constant 0 : index
      %c0_170 = arith.constant 0 : index
      %288 = vector.load %arg4[%c0_168, %c0_169, %c0_170] : memref<2x16x32xf32, #tpu.memory_space<vmem>>, vector<1x16x32xf32>
      %289 = vector.shape_cast %288 : vector<1x16x32xf32> to vector<16x32xf32>
      %cst_171 = arith.constant 1.000000e+00 : f32
      %290 = vector.broadcast %cst_171 : f32 to vector<16x16xf32>
      %291 = arith.subf %287, %290 : vector<16x16xf32>
      %cst_172 = arith.constant 1.000000e+09 : f32
      %292 = vector.broadcast %cst_172 : f32 to vector<16x16xf32>
      %293 = arith.mulf %291, %292 : vector<16x16xf32>
      %c0_173 = arith.constant 0 : index
      %c0_174 = arith.constant 0 : index
      %294 = vector.load %arg24[%c0_173, %c0_174] : memref<32x16xf32, #tpu.memory_space<vmem>>, vector<16x16xf32>
      tpu.vector_store %arg24[%c0_173, %c0_174], %293 {strides = array<i32>} : memref<32x16xf32, #tpu.memory_space<vmem>>, vector<16x16xf32>,
      %295 = vector.broadcast %283 : vector<16x1xf32> to vector<16x16xf32>
      %296 = vector.broadcast %285 : vector<1x16xf32> to vector<16x16xf32>
      %297 = arith.mulf %295, %296 : vector<16x16xf32>
      %298 = arith.mulf %297, %287 : vector<16x16xf32>
      %cst_175 = arith.constant dense<0.000000e+00> : vector<16xf32>
      %299 = vector.multi_reduction <add>, %298, %cst_175 [1] : vector<16x16xf32> to vector<16xf32>
      %300 = vector.shape_cast %299 : vector<16xf32> to vector<16x1xf32>
      %cst_176 = arith.constant 1.000000e-10 : f32
      %301 = vector.broadcast %cst_176 : f32 to vector<16x1xf32>
      %302 = arith.addf %300, %301 : vector<16x1xf32>
      %303 = tpu.reciprocal %302 {approx = true} : vector<16x1xf32> -> vector<16x1xf32>
      %304 = vector.broadcast %303 : vector<16x1xf32> to vector<16x16xf32>
      %305 = arith.mulf %298, %304 : vector<16x16xf32>
      %cst_177 = arith.constant dense<0.000000e+00> : vector<16x32xf32>
      %306 = tpu.matmul %305, %289, %cst_177 {dimension_numbers = #tpu.dot_dimension_numbers<[1], [0], [0], [1], [0, 0, 1, 1], [], []>} : vector<16x16xf32>, vector<16x32xf32>, vector<16x32xf32> -> vector<16x32xf32>
      %cst_178 = arith.constant 1.000000e+00 : f32
      %307 = vector.broadcast %cst_178 : f32 to vector<16x1xf32>
      %308 = arith.subf %307, %283 : vector<16x1xf32>
      %309 = vector.broadcast %308 : vector<16x1xf32> to vector<16x32xf32>
      %310 = arith.mulf %289, %309 : vector<16x32xf32>
      %311 = vector.broadcast %283 : vector<16x1xf32> to vector<16x32xf32>
      %312 = arith.mulf %306, %311 : vector<16x32xf32>
      %313 = arith.addf %310, %312 : vector<16x32xf32>
      %c0_179 = arith.constant 0 : index
      %c0_180 = arith.constant 0 : index
      %c0_181 = arith.constant 0 : index
      %314 = vector.load %arg5[%c0_179, %c0_180, %c0_181] : memref<2x16x32xf32, #tpu.memory_space<vmem>>, vector<1x16x32xf32>
      %315 = vector.shape_cast %314 : vector<1x16x32xf32> to vector<16x32xf32>
      %316 = arith.addf %313, %315 : vector<16x32xf32>
      %c0_182 = arith.constant 0 : index
      %c0_183 = arith.constant 0 : index
      %317 = vector.load %arg6[%c0_182, %c0_183] : memref<1x32xf32, #tpu.memory_space<vmem>>, vector<1x32xf32>
      %c0_184 = arith.constant 0 : index
      %c0_185 = arith.constant 0 : index
      %318 = vector.load %arg7[%c0_184, %c0_185] : memref<1x32xf32, #tpu.memory_space<vmem>>, vector<1x32xf32>
      %cst_186 = arith.constant dense<0.000000e+00> : vector<16xf32>
      %319 = vector.multi_reduction <add>, %316, %cst_186 [1] : vector<16x32xf32> to vector<16xf32>
      %320 = vector.shape_cast %319 : vector<16xf32> to vector<16x1xf32>
      %cst_187 = arith.constant 3.200000e+01 : f32
      %321 = vector.broadcast %cst_187 : f32 to vector<16x1xf32>
      %322 = arith.divf %320, %321 : vector<16x1xf32>
      %323 = vector.broadcast %322 : vector<16x1xf32> to vector<16x32xf32>
      %324 = arith.subf %316, %323 : vector<16x32xf32>
      %325 = arith.mulf %324, %324 : vector<16x32xf32>
      %cst_188 = arith.constant dense<0.000000e+00> : vector<16xf32>
      %326 = vector.multi_reduction <add>, %325, %cst_188 [1] : vector<16x32xf32> to vector<16xf32>
      %327 = vector.shape_cast %326 : vector<16xf32> to vector<16x1xf32>
      %cst_189 = arith.constant 3.200000e+01 : f32
      %328 = vector.broadcast %cst_189 : f32 to vector<16x1xf32>
      %329 = arith.divf %327, %328 : vector<16x1xf32>
      %330 = vector.broadcast %322 : vector<16x1xf32> to vector<16x32xf32>
      %331 = arith.subf %316, %330 : vector<16x32xf32>
      %cst_190 = arith.constant 9.99999974E-6 : f32
      %332 = vector.broadcast %cst_190 : f32 to vector<16x1xf32>
      %333 = arith.addf %329, %332 : vector<16x1xf32>
      %334 = math.rsqrt %333 : vector<16x1xf32>
      %335 = vector.broadcast %334 : vector<16x1xf32> to vector<16x32xf32>
      %336 = arith.mulf %331, %335 : vector<16x32xf32>
      %337 = vector.broadcast %317 : vector<1x32xf32> to vector<16x32xf32>
      %338 = arith.mulf %336, %337 : vector<16x32xf32>
      %339 = vector.broadcast %318 : vector<1x32xf32> to vector<16x32xf32>
      %340 = arith.addf %338, %339 : vector<16x32xf32>
      %c0_191 = arith.constant 0 : index
      %c0_192 = arith.constant 0 : index
      %341 = vector.load %arg21[%c0_191, %c0_192] : memref<32x32xf32, #tpu.memory_space<vmem>>, vector<16x32xf32>
      tpu.vector_store %arg21[%c0_191, %c0_192], %340 {strides = array<i32>} : memref<32x32xf32, #tpu.memory_space<vmem>>, vector<16x32xf32>,
      %c1 = arith.constant 1 : index
      %c0_193 = arith.constant 0 : index
      %c0_194 = arith.constant 0 : index
      %342 = vector.load %arg1[%c1, %c0_193, %c0_194] : memref<2x16x1xf32, #tpu.memory_space<vmem>>, vector<1x16x1xf32>
      %343 = vector.shape_cast %342 : vector<1x16x1xf32> to vector<16x1xf32>
      %c1_195 = arith.constant 1 : index
      %c0_196 = arith.constant 0 : index
      %c0_197 = arith.constant 0 : index
      %344 = vector.load %arg2[%c1_195, %c0_196, %c0_197] : memref<2x1x16xf32, #tpu.memory_space<vmem>>, vector<1x1x16xf32>
      %345 = vector.shape_cast %344 : vector<1x1x16xf32> to vector<1x16xf32>
      %c1_198 = arith.constant 1 : index
      %c0_199 = arith.constant 0 : index
      %c0_200 = arith.constant 0 : index
      %346 = vector.load %arg3[%c1_198, %c0_199, %c0_200] : memref<2x16x16xf32, #tpu.memory_space<vmem>>, vector<1x16x16xf32>
      %347 = vector.shape_cast %346 : vector<1x16x16xf32> to vector<16x16xf32>
      %c1_201 = arith.constant 1 : index
      %c0_202 = arith.constant 0 : index
      %c0_203 = arith.constant 0 : index
      %348 = vector.load %arg4[%c1_201, %c0_202, %c0_203] : memref<2x16x32xf32, #tpu.memory_space<vmem>>, vector<1x16x32xf32>
      %349 = vector.shape_cast %348 : vector<1x16x32xf32> to vector<16x32xf32>
      %cst_204 = arith.constant 1.000000e+00 : f32
      %350 = vector.broadcast %cst_204 : f32 to vector<16x16xf32>
      %351 = arith.subf %347, %350 : vector<16x16xf32>
      %cst_205 = arith.constant 1.000000e+09 : f32
      %352 = vector.broadcast %cst_205 : f32 to vector<16x16xf32>
      %353 = arith.mulf %351, %352 : vector<16x16xf32>
      %c16_206 = arith.constant 16 : index
      %c0_207 = arith.constant 0 : index
      %354 = vector.load %arg24[%c16_206, %c0_207] : memref<32x16xf32, #tpu.memory_space<vmem>>, vector<16x16xf32>
      tpu.vector_store %arg24[%c16_206, %c0_207], %353 {strides = array<i32>} : memref<32x16xf32, #tpu.memory_space<vmem>>, vector<16x16xf32>,
      %355 = vector.broadcast %343 : vector<16x1xf32> to vector<16x16xf32>
      %356 = vector.broadcast %345 : vector<1x16xf32> to vector<16x16xf32>
      %357 = arith.mulf %355, %356 : vector<16x16xf32>
      %358 = arith.mulf %357, %347 : vector<16x16xf32>
      %cst_208 = arith.constant dense<0.000000e+00> : vector<16xf32>
      %359 = vector.multi_reduction <add>, %358, %cst_208 [1] : vector<16x16xf32> to vector<16xf32>
      %360 = vector.shape_cast %359 : vector<16xf32> to vector<16x1xf32>
      %cst_209 = arith.constant 1.000000e-10 : f32
      %361 = vector.broadcast %cst_209 : f32 to vector<16x1xf32>
      %362 = arith.addf %360, %361 : vector<16x1xf32>
      %363 = tpu.reciprocal %362 {approx = true} : vector<16x1xf32> -> vector<16x1xf32>
      %364 = vector.broadcast %363 : vector<16x1xf32> to vector<16x16xf32>
      %365 = arith.mulf %358, %364 : vector<16x16xf32>
      %cst_210 = arith.constant dense<0.000000e+00> : vector<16x32xf32>
      %366 = tpu.matmul %365, %349, %cst_210 {dimension_numbers = #tpu.dot_dimension_numbers<[1], [0], [0], [1], [0, 0, 1, 1], [], []>} : vector<16x16xf32>, vector<16x32xf32>, vector<16x32xf32> -> vector<16x32xf32>
      %cst_211 = arith.constant 1.000000e+00 : f32
      %367 = vector.broadcast %cst_211 : f32 to vector<16x1xf32>
      %368 = arith.subf %367, %343 : vector<16x1xf32>
      %369 = vector.broadcast %368 : vector<16x1xf32> to vector<16x32xf32>
      %370 = arith.mulf %349, %369 : vector<16x32xf32>
      %371 = vector.broadcast %343 : vector<16x1xf32> to vector<16x32xf32>
      %372 = arith.mulf %366, %371 : vector<16x32xf32>
      %373 = arith.addf %370, %372 : vector<16x32xf32>
      %c1_212 = arith.constant 1 : index
      %c0_213 = arith.constant 0 : index
      %c0_214 = arith.constant 0 : index
      %374 = vector.load %arg5[%c1_212, %c0_213, %c0_214] : memref<2x16x32xf32, #tpu.memory_space<vmem>>, vector<1x16x32xf32>
      %375 = vector.shape_cast %374 : vector<1x16x32xf32> to vector<16x32xf32>
      %376 = arith.addf %373, %375 : vector<16x32xf32>
      %c0_215 = arith.constant 0 : index
      %c0_216 = arith.constant 0 : index
      %377 = vector.load %arg6[%c0_215, %c0_216] : memref<1x32xf32, #tpu.memory_space<vmem>>, vector<1x32xf32>
      %c0_217 = arith.constant 0 : index
      %c0_218 = arith.constant 0 : index
      %378 = vector.load %arg7[%c0_217, %c0_218] : memref<1x32xf32, #tpu.memory_space<vmem>>, vector<1x32xf32>
      %cst_219 = arith.constant dense<0.000000e+00> : vector<16xf32>
      %379 = vector.multi_reduction <add>, %376, %cst_219 [1] : vector<16x32xf32> to vector<16xf32>
      %380 = vector.shape_cast %379 : vector<16xf32> to vector<16x1xf32>
      %cst_220 = arith.constant 3.200000e+01 : f32
      %381 = vector.broadcast %cst_220 : f32 to vector<16x1xf32>
      %382 = arith.divf %380, %381 : vector<16x1xf32>
      %383 = vector.broadcast %382 : vector<16x1xf32> to vector<16x32xf32>
      %384 = arith.subf %376, %383 : vector<16x32xf32>
      %385 = arith.mulf %384, %384 : vector<16x32xf32>
      %cst_221 = arith.constant dense<0.000000e+00> : vector<16xf32>
      %386 = vector.multi_reduction <add>, %385, %cst_221 [1] : vector<16x32xf32> to vector<16xf32>
      %387 = vector.shape_cast %386 : vector<16xf32> to vector<16x1xf32>
      %cst_222 = arith.constant 3.200000e+01 : f32
      %388 = vector.broadcast %cst_222 : f32 to vector<16x1xf32>
      %389 = arith.divf %387, %388 : vector<16x1xf32>
      %390 = vector.broadcast %382 : vector<16x1xf32> to vector<16x32xf32>
      %391 = arith.subf %376, %390 : vector<16x32xf32>
      %cst_223 = arith.constant 9.99999974E-6 : f32
      %392 = vector.broadcast %cst_223 : f32 to vector<16x1xf32>
      %393 = arith.addf %389, %392 : vector<16x1xf32>
      %394 = math.rsqrt %393 : vector<16x1xf32>
      %395 = vector.broadcast %394 : vector<16x1xf32> to vector<16x32xf32>
      %396 = arith.mulf %391, %395 : vector<16x32xf32>
      %397 = vector.broadcast %377 : vector<1x32xf32> to vector<16x32xf32>
      %398 = arith.mulf %396, %397 : vector<16x32xf32>
      %399 = vector.broadcast %378 : vector<1x32xf32> to vector<16x32xf32>
      %400 = arith.addf %398, %399 : vector<16x32xf32>
      %c16_224 = arith.constant 16 : index
      %c0_225 = arith.constant 0 : index
      %401 = vector.load %arg21[%c16_224, %c0_225] : memref<32x32xf32, #tpu.memory_space<vmem>>, vector<16x32xf32>
      tpu.vector_store %arg21[%c16_224, %c0_225], %400 {strides = array<i32>} : memref<32x32xf32, #tpu.memory_space<vmem>>, vector<16x32xf32>,
    } else {
    }
    %c0 = arith.constant 0 : index
    %c0_1 = arith.constant 0 : index
    %3 = vector.load %arg21[%c0, %c0_1] : memref<32x32xf32, #tpu.memory_space<vmem>>, vector<32x32xf32>
    %c0_2 = arith.constant 0 : index
    %c0_3 = arith.constant 0 : index
    %c0_4 = arith.constant 0 : index
    %4 = vector.load %arg8[%c0_2, %c0_3, %c0_4] : memref<1x32x96xf32, #tpu.memory_space<vmem>>, vector<1x32x96xf32>
    %5 = vector.shape_cast %4 : vector<1x32x96xf32> to vector<32x96xf32>
    %cst = arith.constant dense<0.000000e+00> : vector<32x96xf32>
    %6 = tpu.matmul %3, %5, %cst {dimension_numbers = #tpu.dot_dimension_numbers<[1], [0], [0], [1], [0, 0, 1, 1], [], []>} : vector<32x32xf32>, vector<32x96xf32>, vector<32x96xf32> -> vector<32x96xf32>
    %c0_5 = arith.constant 0 : index
    %c0_6 = arith.constant 0 : index
    %c0_7 = arith.constant 0 : index
    %7 = vector.load %arg9[%c0_5, %c0_6, %c0_7] : memref<1x1x96xf32, #tpu.memory_space<vmem>>, vector<1x1x96xf32>
    %8 = vector.shape_cast %7 : vector<1x1x96xf32> to vector<1x96xf32>
    %9 = vector.broadcast %8 : vector<1x96xf32> to vector<32x96xf32>
    %10 = arith.addf %6, %9 : vector<32x96xf32>
    %c0_8 = arith.constant 0 : index
    %c0_9 = arith.constant 0 : index
    %11 = vector.load %arg22[%c0_8, %c0_9] : memref<32x96xf32, #tpu.memory_space<vmem>>, vector<32x96xf32>
    tpu.vector_store %arg22[%c0_8, %c0_9], %10 {strides = array<i32>} : memref<32x96xf32, #tpu.memory_space<vmem>>, vector<32x96xf32>,
    %c0_10 = arith.constant 0 : index
    %c0_11 = arith.constant 0 : index
    %c0_12 = arith.constant 0 : index
    %12 = vector.load %arg10[%c0_10, %c0_11, %c0_12] : memref<1x32x32xf32, #tpu.memory_space<vmem>>, vector<1x32x32xf32>
    %13 = vector.shape_cast %12 : vector<1x32x32xf32> to vector<32x32xf32>
    %c0_13 = arith.constant 0 : index
    %c0_14 = arith.constant 0 : index
    %14 = vector.load %arg24[%c0_13, %c0_14] : memref<32x16xf32, #tpu.memory_space<vmem>>, vector<16x16xf32>
    %cst_15 = arith.constant 0.000000e+00 : f32
    %15 = vector.broadcast %cst_15 : f32 to vector<16x32xf32>
    %c0_16 = arith.constant 0 : index
    %c0_17 = arith.constant 0 : index
    %16 = vector.load %arg22[%c0_16, %c0_17] : memref<32x96xf32, #tpu.memory_space<vmem>>, vector<16x8xf32>
    %cst_18 = arith.constant 0.353553385 : f32
    %17 = vector.broadcast %cst_18 : f32 to vector<16x8xf32>
    %18 = arith.mulf %16, %17 : vector<16x8xf32>
    %c0_19 = arith.constant 0 : index
    %c32 = arith.constant 32 : index
    %19 = vector.load %arg22[%c0_19, %c32] : memref<32x96xf32, #tpu.memory_space<vmem>>, vector<16x8xf32>
    %c0_20 = arith.constant 0 : index
    %c64 = arith.constant 64 : index
    %20 = vector.load %arg22[%c0_20, %c64] : memref<32x96xf32, #tpu.memory_space<vmem>>, vector<16x8xf32>
    %cst_21 = arith.constant dense<0.000000e+00> : vector<16x16xf32>
    %21 = tpu.matmul %18, %19, %cst_21 {dimension_numbers = #tpu.dot_dimension_numbers<[1], [1], [0], [0], [0, 0, 1, 0], [], []>} : vector<16x8xf32>, vector<16x8xf32>, vector<16x16xf32> -> vector<16x16xf32>
    %22 = arith.addf %21, %14 : vector<16x16xf32>
    %cst_22 = arith.constant dense<0xFF800000> : vector<16xf32>
    %23 = vector.multi_reduction <maximumf>, %22, %cst_22 [1] : vector<16x16xf32> to vector<16xf32>
    %24 = vector.shape_cast %23 : vector<16xf32> to vector<16x1xf32>
    %25 = vector.broadcast %24 : vector<16x1xf32> to vector<16x16xf32>
    %26 = arith.subf %22, %25 : vector<16x16xf32>
    %27 = math.exp %26 : vector<16x16xf32>
    %cst_23 = arith.constant dense<0.000000e+00> : vector<16xf32>
    %28 = vector.multi_reduction <add>, %27, %cst_23 [1] : vector<16x16xf32> to vector<16xf32>
    %29 = vector.shape_cast %28 : vector<16xf32> to vector<16x1xf32>
    %30 = tpu.reciprocal %29 {approx = true} : vector<16x1xf32> -> vector<16x1xf32>
    %31 = vector.broadcast %30 : vector<16x1xf32> to vector<16x16xf32>
    %32 = arith.mulf %27, %31 : vector<16x16xf32>
    %cst_24 = arith.constant dense<0.000000e+00> : vector<16x8xf32>
    %33 = tpu.matmul %32, %20, %cst_24 {dimension_numbers = #tpu.dot_dimension_numbers<[1], [0], [0], [1], [0, 0, 1, 1], [], []>} : vector<16x16xf32>, vector<16x8xf32>, vector<16x8xf32> -> vector<16x8xf32>
    %34 = vector.extract_strided_slice %13 {offsets = [0, 0], sizes = [8, 32], strides = [1, 1]} : vector<32x32xf32> to vector<8x32xf32>
    %cst_25 = arith.constant dense<0.000000e+00> : vector<16x32xf32>
    %35 = tpu.matmul %33, %34, %cst_25 {dimension_numbers = #tpu.dot_dimension_numbers<[1], [0], [0], [1], [0, 0, 1, 1], [], []>} : vector<16x8xf32>, vector<8x32xf32>, vector<16x32xf32> -> vector<16x32xf32>
    %36 = arith.addf %15, %35 : vector<16x32xf32>
    %c0_26 = arith.constant 0 : index
    %c8 = arith.constant 8 : index
    %37 = vector.load %arg22[%c0_26, %c8] : memref<32x96xf32, #tpu.memory_space<vmem>>, vector<16x8xf32>
    %cst_27 = arith.constant 0.353553385 : f32
    %38 = vector.broadcast %cst_27 : f32 to vector<16x8xf32>
    %39 = arith.mulf %37, %38 : vector<16x8xf32>
    %c0_28 = arith.constant 0 : index
    %c40 = arith.constant 40 : index
    %40 = vector.load %arg22[%c0_28, %c40] : memref<32x96xf32, #tpu.memory_space<vmem>>, vector<16x8xf32>
    %c0_29 = arith.constant 0 : index
    %c72 = arith.constant 72 : index
    %41 = vector.load %arg22[%c0_29, %c72] : memref<32x96xf32, #tpu.memory_space<vmem>>, vector<16x8xf32>
    %cst_30 = arith.constant dense<0.000000e+00> : vector<16x16xf32>
    %42 = tpu.matmul %39, %40, %cst_30 {dimension_numbers = #tpu.dot_dimension_numbers<[1], [1], [0], [0], [0, 0, 1, 0], [], []>} : vector<16x8xf32>, vector<16x8xf32>, vector<16x16xf32> -> vector<16x16xf32>
    %43 = arith.addf %42, %14 : vector<16x16xf32>
    %cst_31 = arith.constant dense<0xFF800000> : vector<16xf32>
    %44 = vector.multi_reduction <maximumf>, %43, %cst_31 [1] : vector<16x16xf32> to vector<16xf32>
    %45 = vector.shape_cast %44 : vector<16xf32> to vector<16x1xf32>
    %46 = vector.broadcast %45 : vector<16x1xf32> to vector<16x16xf32>
    %47 = arith.subf %43, %46 : vector<16x16xf32>
    %48 = math.exp %47 : vector<16x16xf32>
    %cst_32 = arith.constant dense<0.000000e+00> : vector<16xf32>
    %49 = vector.multi_reduction <add>, %48, %cst_32 [1] : vector<16x16xf32> to vector<16xf32>
    %50 = vector.shape_cast %49 : vector<16xf32> to vector<16x1xf32>
    %51 = tpu.reciprocal %50 {approx = true} : vector<16x1xf32> -> vector<16x1xf32>
    %52 = vector.broadcast %51 : vector<16x1xf32> to vector<16x16xf32>
    %53 = arith.mulf %48, %52 : vector<16x16xf32>
    %cst_33 = arith.constant dense<0.000000e+00> : vector<16x8xf32>
    %54 = tpu.matmul %53, %41, %cst_33 {dimension_numbers = #tpu.dot_dimension_numbers<[1], [0], [0], [1], [0, 0, 1, 1], [], []>} : vector<16x16xf32>, vector<16x8xf32>, vector<16x8xf32> -> vector<16x8xf32>
    %55 = vector.extract_strided_slice %13 {offsets = [8, 0], sizes = [8, 32], strides = [1, 1]} : vector<32x32xf32> to vector<8x32xf32>
    %cst_34 = arith.constant dense<0.000000e+00> : vector<16x32xf32>
    %56 = tpu.matmul %54, %55, %cst_34 {dimension_numbers = #tpu.dot_dimension_numbers<[1], [0], [0], [1], [0, 0, 1, 1], [], []>} : vector<16x8xf32>, vector<8x32xf32>, vector<16x32xf32> -> vector<16x32xf32>
    %57 = arith.addf %36, %56 : vector<16x32xf32>
    %c0_35 = arith.constant 0 : index
    %c16 = arith.constant 16 : index
    %58 = vector.load %arg22[%c0_35, %c16] : memref<32x96xf32, #tpu.memory_space<vmem>>, vector<16x8xf32>
    %cst_36 = arith.constant 0.353553385 : f32
    %59 = vector.broadcast %cst_36 : f32 to vector<16x8xf32>
    %60 = arith.mulf %58, %59 : vector<16x8xf32>
    %c0_37 = arith.constant 0 : index
    %c48 = arith.constant 48 : index
    %61 = vector.load %arg22[%c0_37, %c48] : memref<32x96xf32, #tpu.memory_space<vmem>>, vector<16x8xf32>
    %c0_38 = arith.constant 0 : index
    %c80 = arith.constant 80 : index
    %62 = vector.load %arg22[%c0_38, %c80] : memref<32x96xf32, #tpu.memory_space<vmem>>, vector<16x8xf32>
    %cst_39 = arith.constant dense<0.000000e+00> : vector<16x16xf32>
    %63 = tpu.matmul %60, %61, %cst_39 {dimension_numbers = #tpu.dot_dimension_numbers<[1], [1], [0], [0], [0, 0, 1, 0], [], []>} : vector<16x8xf32>, vector<16x8xf32>, vector<16x16xf32> -> vector<16x16xf32>
    %64 = arith.addf %63, %14 : vector<16x16xf32>
    %cst_40 = arith.constant dense<0xFF800000> : vector<16xf32>
    %65 = vector.multi_reduction <maximumf>, %64, %cst_40 [1] : vector<16x16xf32> to vector<16xf32>
    %66 = vector.shape_cast %65 : vector<16xf32> to vector<16x1xf32>
    %67 = vector.broadcast %66 : vector<16x1xf32> to vector<16x16xf32>
    %68 = arith.subf %64, %67 : vector<16x16xf32>
    %69 = math.exp %68 : vector<16x16xf32>
    %cst_41 = arith.constant dense<0.000000e+00> : vector<16xf32>
    %70 = vector.multi_reduction <add>, %69, %cst_41 [1] : vector<16x16xf32> to vector<16xf32>
    %71 = vector.shape_cast %70 : vector<16xf32> to vector<16x1xf32>
    %72 = tpu.reciprocal %71 {approx = true} : vector<16x1xf32> -> vector<16x1xf32>
    %73 = vector.broadcast %72 : vector<16x1xf32> to vector<16x16xf32>
    %74 = arith.mulf %69, %73 : vector<16x16xf32>
    %cst_42 = arith.constant dense<0.000000e+00> : vector<16x8xf32>
    %75 = tpu.matmul %74, %62, %cst_42 {dimension_numbers = #tpu.dot_dimension_numbers<[1], [0], [0], [1], [0, 0, 1, 1], [], []>} : vector<16x16xf32>, vector<16x8xf32>, vector<16x8xf32> -> vector<16x8xf32>
    %76 = vector.extract_strided_slice %13 {offsets = [16, 0], sizes = [8, 32], strides = [1, 1]} : vector<32x32xf32> to vector<8x32xf32>
    %cst_43 = arith.constant dense<0.000000e+00> : vector<16x32xf32>
    %77 = tpu.matmul %75, %76, %cst_43 {dimension_numbers = #tpu.dot_dimension_numbers<[1], [0], [0], [1], [0, 0, 1, 1], [], []>} : vector<16x8xf32>, vector<8x32xf32>, vector<16x32xf32> -> vector<16x32xf32>
    %78 = arith.addf %57, %77 : vector<16x32xf32>
    %c0_44 = arith.constant 0 : index
    %c24 = arith.constant 24 : index
    %79 = vector.load %arg22[%c0_44, %c24] : memref<32x96xf32, #tpu.memory_space<vmem>>, vector<16x8xf32>
    %cst_45 = arith.constant 0.353553385 : f32
    %80 = vector.broadcast %cst_45 : f32 to vector<16x8xf32>
    %81 = arith.mulf %79, %80 : vector<16x8xf32>
    %c0_46 = arith.constant 0 : index
    %c56 = arith.constant 56 : index
    %82 = vector.load %arg22[%c0_46, %c56] : memref<32x96xf32, #tpu.memory_space<vmem>>, vector<16x8xf32>
    %c0_47 = arith.constant 0 : index
    %c88 = arith.constant 88 : index
    %83 = vector.load %arg22[%c0_47, %c88] : memref<32x96xf32, #tpu.memory_space<vmem>>, vector<16x8xf32>
    %cst_48 = arith.constant dense<0.000000e+00> : vector<16x16xf32>
    %84 = tpu.matmul %81, %82, %cst_48 {dimension_numbers = #tpu.dot_dimension_numbers<[1], [1], [0], [0], [0, 0, 1, 0], [], []>} : vector<16x8xf32>, vector<16x8xf32>, vector<16x16xf32> -> vector<16x16xf32>
    %85 = arith.addf %84, %14 : vector<16x16xf32>
    %cst_49 = arith.constant dense<0xFF800000> : vector<16xf32>
    %86 = vector.multi_reduction <maximumf>, %85, %cst_49 [1] : vector<16x16xf32> to vector<16xf32>
    %87 = vector.shape_cast %86 : vector<16xf32> to vector<16x1xf32>
    %88 = vector.broadcast %87 : vector<16x1xf32> to vector<16x16xf32>
    %89 = arith.subf %85, %88 : vector<16x16xf32>
    %90 = math.exp %89 : vector<16x16xf32>
    %cst_50 = arith.constant dense<0.000000e+00> : vector<16xf32>
    %91 = vector.multi_reduction <add>, %90, %cst_50 [1] : vector<16x16xf32> to vector<16xf32>
    %92 = vector.shape_cast %91 : vector<16xf32> to vector<16x1xf32>
    %93 = tpu.reciprocal %92 {approx = true} : vector<16x1xf32> -> vector<16x1xf32>
    %94 = vector.broadcast %93 : vector<16x1xf32> to vector<16x16xf32>
    %95 = arith.mulf %90, %94 : vector<16x16xf32>
    %cst_51 = arith.constant dense<0.000000e+00> : vector<16x8xf32>
    %96 = tpu.matmul %95, %83, %cst_51 {dimension_numbers = #tpu.dot_dimension_numbers<[1], [0], [0], [1], [0, 0, 1, 1], [], []>} : vector<16x16xf32>, vector<16x8xf32>, vector<16x8xf32> -> vector<16x8xf32>
    %97 = vector.extract_strided_slice %13 {offsets = [24, 0], sizes = [8, 32], strides = [1, 1]} : vector<32x32xf32> to vector<8x32xf32>
    %cst_52 = arith.constant dense<0.000000e+00> : vector<16x32xf32>
    %98 = tpu.matmul %96, %97, %cst_52 {dimension_numbers = #tpu.dot_dimension_numbers<[1], [0], [0], [1], [0, 0, 1, 1], [], []>} : vector<16x8xf32>, vector<8x32xf32>, vector<16x32xf32> -> vector<16x32xf32>
    %99 = arith.addf %78, %98 : vector<16x32xf32>
    %c0_53 = arith.constant 0 : index
    %c0_54 = arith.constant 0 : index
    %c0_55 = arith.constant 0 : index
    %100 = vector.load %arg11[%c0_53, %c0_54, %c0_55] : memref<1x1x32xf32, #tpu.memory_space<vmem>>, vector<1x1x32xf32>
    %101 = vector.shape_cast %100 : vector<1x1x32xf32> to vector<1x32xf32>
    %102 = vector.broadcast %101 : vector<1x32xf32> to vector<16x32xf32>
    %103 = arith.addf %99, %102 : vector<16x32xf32>
    %c0_56 = arith.constant 0 : index
    %c0_57 = arith.constant 0 : index
    %104 = vector.load %arg23[%c0_56, %c0_57] : memref<32x32xf32, #tpu.memory_space<vmem>>, vector<16x32xf32>
    tpu.vector_store %arg23[%c0_56, %c0_57], %103 {strides = array<i32>} : memref<32x32xf32, #tpu.memory_space<vmem>>, vector<16x32xf32>,
    %c16_58 = arith.constant 16 : index
    %c0_59 = arith.constant 0 : index
    %105 = vector.load %arg24[%c16_58, %c0_59] : memref<32x16xf32, #tpu.memory_space<vmem>>, vector<16x16xf32>
    %cst_60 = arith.constant 0.000000e+00 : f32
    %106 = vector.broadcast %cst_60 : f32 to vector<16x32xf32>
    %c16_61 = arith.constant 16 : index
    %c0_62 = arith.constant 0 : index
    %107 = vector.load %arg22[%c16_61, %c0_62] : memref<32x96xf32, #tpu.memory_space<vmem>>, vector<16x8xf32>
    %cst_63 = arith.constant 0.353553385 : f32
    %108 = vector.broadcast %cst_63 : f32 to vector<16x8xf32>
    %109 = arith.mulf %107, %108 : vector<16x8xf32>
    %c16_64 = arith.constant 16 : index
    %c32_65 = arith.constant 32 : index
    %110 = vector.load %arg22[%c16_64, %c32_65] : memref<32x96xf32, #tpu.memory_space<vmem>>, vector<16x8xf32>
    %c16_66 = arith.constant 16 : index
    %c64_67 = arith.constant 64 : index
    %111 = vector.load %arg22[%c16_66, %c64_67] : memref<32x96xf32, #tpu.memory_space<vmem>>, vector<16x8xf32>
    %cst_68 = arith.constant dense<0.000000e+00> : vector<16x16xf32>
    %112 = tpu.matmul %109, %110, %cst_68 {dimension_numbers = #tpu.dot_dimension_numbers<[1], [1], [0], [0], [0, 0, 1, 0], [], []>} : vector<16x8xf32>, vector<16x8xf32>, vector<16x16xf32> -> vector<16x16xf32>
    %113 = arith.addf %112, %105 : vector<16x16xf32>
    %cst_69 = arith.constant dense<0xFF800000> : vector<16xf32>
    %114 = vector.multi_reduction <maximumf>, %113, %cst_69 [1] : vector<16x16xf32> to vector<16xf32>
    %115 = vector.shape_cast %114 : vector<16xf32> to vector<16x1xf32>
    %116 = vector.broadcast %115 : vector<16x1xf32> to vector<16x16xf32>
    %117 = arith.subf %113, %116 : vector<16x16xf32>
    %118 = math.exp %117 : vector<16x16xf32>
    %cst_70 = arith.constant dense<0.000000e+00> : vector<16xf32>
    %119 = vector.multi_reduction <add>, %118, %cst_70 [1] : vector<16x16xf32> to vector<16xf32>
    %120 = vector.shape_cast %119 : vector<16xf32> to vector<16x1xf32>
    %121 = tpu.reciprocal %120 {approx = true} : vector<16x1xf32> -> vector<16x1xf32>
    %122 = vector.broadcast %121 : vector<16x1xf32> to vector<16x16xf32>
    %123 = arith.mulf %118, %122 : vector<16x16xf32>
    %cst_71 = arith.constant dense<0.000000e+00> : vector<16x8xf32>
    %124 = tpu.matmul %123, %111, %cst_71 {dimension_numbers = #tpu.dot_dimension_numbers<[1], [0], [0], [1], [0, 0, 1, 1], [], []>} : vector<16x16xf32>, vector<16x8xf32>, vector<16x8xf32> -> vector<16x8xf32>
    %125 = vector.extract_strided_slice %13 {offsets = [0, 0], sizes = [8, 32], strides = [1, 1]} : vector<32x32xf32> to vector<8x32xf32>
    %cst_72 = arith.constant dense<0.000000e+00> : vector<16x32xf32>
    %126 = tpu.matmul %124, %125, %cst_72 {dimension_numbers = #tpu.dot_dimension_numbers<[1], [0], [0], [1], [0, 0, 1, 1], [], []>} : vector<16x8xf32>, vector<8x32xf32>, vector<16x32xf32> -> vector<16x32xf32>
    %127 = arith.addf %106, %126 : vector<16x32xf32>
    %c16_73 = arith.constant 16 : index
    %c8_74 = arith.constant 8 : index
    %128 = vector.load %arg22[%c16_73, %c8_74] : memref<32x96xf32, #tpu.memory_space<vmem>>, vector<16x8xf32>
    %cst_75 = arith.constant 0.353553385 : f32
    %129 = vector.broadcast %cst_75 : f32 to vector<16x8xf32>
    %130 = arith.mulf %128, %129 : vector<16x8xf32>
    %c16_76 = arith.constant 16 : index
    %c40_77 = arith.constant 40 : index
    %131 = vector.load %arg22[%c16_76, %c40_77] : memref<32x96xf32, #tpu.memory_space<vmem>>, vector<16x8xf32>
    %c16_78 = arith.constant 16 : index
    %c72_79 = arith.constant 72 : index
    %132 = vector.load %arg22[%c16_78, %c72_79] : memref<32x96xf32, #tpu.memory_space<vmem>>, vector<16x8xf32>
    %cst_80 = arith.constant dense<0.000000e+00> : vector<16x16xf32>
    %133 = tpu.matmul %130, %131, %cst_80 {dimension_numbers = #tpu.dot_dimension_numbers<[1], [1], [0], [0], [0, 0, 1, 0], [], []>} : vector<16x8xf32>, vector<16x8xf32>, vector<16x16xf32> -> vector<16x16xf32>
    %134 = arith.addf %133, %105 : vector<16x16xf32>
    %cst_81 = arith.constant dense<0xFF800000> : vector<16xf32>
    %135 = vector.multi_reduction <maximumf>, %134, %cst_81 [1] : vector<16x16xf32> to vector<16xf32>
    %136 = vector.shape_cast %135 : vector<16xf32> to vector<16x1xf32>
    %137 = vector.broadcast %136 : vector<16x1xf32> to vector<16x16xf32>
    %138 = arith.subf %134, %137 : vector<16x16xf32>
    %139 = math.exp %138 : vector<16x16xf32>
    %cst_82 = arith.constant dense<0.000000e+00> : vector<16xf32>
    %140 = vector.multi_reduction <add>, %139, %cst_82 [1] : vector<16x16xf32> to vector<16xf32>
    %141 = vector.shape_cast %140 : vector<16xf32> to vector<16x1xf32>
    %142 = tpu.reciprocal %141 {approx = true} : vector<16x1xf32> -> vector<16x1xf32>
    %143 = vector.broadcast %142 : vector<16x1xf32> to vector<16x16xf32>
    %144 = arith.mulf %139, %143 : vector<16x16xf32>
    %cst_83 = arith.constant dense<0.000000e+00> : vector<16x8xf32>
    %145 = tpu.matmul %144, %132, %cst_83 {dimension_numbers = #tpu.dot_dimension_numbers<[1], [0], [0], [1], [0, 0, 1, 1], [], []>} : vector<16x16xf32>, vector<16x8xf32>, vector<16x8xf32> -> vector<16x8xf32>
    %146 = vector.extract_strided_slice %13 {offsets = [8, 0], sizes = [8, 32], strides = [1, 1]} : vector<32x32xf32> to vector<8x32xf32>
    %cst_84 = arith.constant dense<0.000000e+00> : vector<16x32xf32>
    %147 = tpu.matmul %145, %146, %cst_84 {dimension_numbers = #tpu.dot_dimension_numbers<[1], [0], [0], [1], [0, 0, 1, 1], [], []>} : vector<16x8xf32>, vector<8x32xf32>, vector<16x32xf32> -> vector<16x32xf32>
    %148 = arith.addf %127, %147 : vector<16x32xf32>
    %c16_85 = arith.constant 16 : index
    %c16_86 = arith.constant 16 : index
    %149 = vector.load %arg22[%c16_85, %c16_86] : memref<32x96xf32, #tpu.memory_space<vmem>>, vector<16x8xf32>
    %cst_87 = arith.constant 0.353553385 : f32
    %150 = vector.broadcast %cst_87 : f32 to vector<16x8xf32>
    %151 = arith.mulf %149, %150 : vector<16x8xf32>
    %c16_88 = arith.constant 16 : index
    %c48_89 = arith.constant 48 : index
    %152 = vector.load %arg22[%c16_88, %c48_89] : memref<32x96xf32, #tpu.memory_space<vmem>>, vector<16x8xf32>
    %c16_90 = arith.constant 16 : index
    %c80_91 = arith.constant 80 : index
    %153 = vector.load %arg22[%c16_90, %c80_91] : memref<32x96xf32, #tpu.memory_space<vmem>>, vector<16x8xf32>
    %cst_92 = arith.constant dense<0.000000e+00> : vector<16x16xf32>
    %154 = tpu.matmul %151, %152, %cst_92 {dimension_numbers = #tpu.dot_dimension_numbers<[1], [1], [0], [0], [0, 0, 1, 0], [], []>} : vector<16x8xf32>, vector<16x8xf32>, vector<16x16xf32> -> vector<16x16xf32>
    %155 = arith.addf %154, %105 : vector<16x16xf32>
    %cst_93 = arith.constant dense<0xFF800000> : vector<16xf32>
    %156 = vector.multi_reduction <maximumf>, %155, %cst_93 [1] : vector<16x16xf32> to vector<16xf32>
    %157 = vector.shape_cast %156 : vector<16xf32> to vector<16x1xf32>
    %158 = vector.broadcast %157 : vector<16x1xf32> to vector<16x16xf32>
    %159 = arith.subf %155, %158 : vector<16x16xf32>
    %160 = math.exp %159 : vector<16x16xf32>
    %cst_94 = arith.constant dense<0.000000e+00> : vector<16xf32>
    %161 = vector.multi_reduction <add>, %160, %cst_94 [1] : vector<16x16xf32> to vector<16xf32>
    %162 = vector.shape_cast %161 : vector<16xf32> to vector<16x1xf32>
    %163 = tpu.reciprocal %162 {approx = true} : vector<16x1xf32> -> vector<16x1xf32>
    %164 = vector.broadcast %163 : vector<16x1xf32> to vector<16x16xf32>
    %165 = arith.mulf %160, %164 : vector<16x16xf32>
    %cst_95 = arith.constant dense<0.000000e+00> : vector<16x8xf32>
    %166 = tpu.matmul %165, %153, %cst_95 {dimension_numbers = #tpu.dot_dimension_numbers<[1], [0], [0], [1], [0, 0, 1, 1], [], []>} : vector<16x16xf32>, vector<16x8xf32>, vector<16x8xf32> -> vector<16x8xf32>
    %167 = vector.extract_strided_slice %13 {offsets = [16, 0], sizes = [8, 32], strides = [1, 1]} : vector<32x32xf32> to vector<8x32xf32>
    %cst_96 = arith.constant dense<0.000000e+00> : vector<16x32xf32>
    %168 = tpu.matmul %166, %167, %cst_96 {dimension_numbers = #tpu.dot_dimension_numbers<[1], [0], [0], [1], [0, 0, 1, 1], [], []>} : vector<16x8xf32>, vector<8x32xf32>, vector<16x32xf32> -> vector<16x32xf32>
    %169 = arith.addf %148, %168 : vector<16x32xf32>
    %c16_97 = arith.constant 16 : index
    %c24_98 = arith.constant 24 : index
    %170 = vector.load %arg22[%c16_97, %c24_98] : memref<32x96xf32, #tpu.memory_space<vmem>>, vector<16x8xf32>
    %cst_99 = arith.constant 0.353553385 : f32
    %171 = vector.broadcast %cst_99 : f32 to vector<16x8xf32>
    %172 = arith.mulf %170, %171 : vector<16x8xf32>
    %c16_100 = arith.constant 16 : index
    %c56_101 = arith.constant 56 : index
    %173 = vector.load %arg22[%c16_100, %c56_101] : memref<32x96xf32, #tpu.memory_space<vmem>>, vector<16x8xf32>
    %c16_102 = arith.constant 16 : index
    %c88_103 = arith.constant 88 : index
    %174 = vector.load %arg22[%c16_102, %c88_103] : memref<32x96xf32, #tpu.memory_space<vmem>>, vector<16x8xf32>
    %cst_104 = arith.constant dense<0.000000e+00> : vector<16x16xf32>
    %175 = tpu.matmul %172, %173, %cst_104 {dimension_numbers = #tpu.dot_dimension_numbers<[1], [1], [0], [0], [0, 0, 1, 0], [], []>} : vector<16x8xf32>, vector<16x8xf32>, vector<16x16xf32> -> vector<16x16xf32>
    %176 = arith.addf %175, %105 : vector<16x16xf32>
    %cst_105 = arith.constant dense<0xFF800000> : vector<16xf32>
    %177 = vector.multi_reduction <maximumf>, %176, %cst_105 [1] : vector<16x16xf32> to vector<16xf32>
    %178 = vector.shape_cast %177 : vector<16xf32> to vector<16x1xf32>
    %179 = vector.broadcast %178 : vector<16x1xf32> to vector<16x16xf32>
    %180 = arith.subf %176, %179 : vector<16x16xf32>
    %181 = math.exp %180 : vector<16x16xf32>
    %cst_106 = arith.constant dense<0.000000e+00> : vector<16xf32>
    %182 = vector.multi_reduction <add>, %181, %cst_106 [1] : vector<16x16xf32> to vector<16xf32>
    %183 = vector.shape_cast %182 : vector<16xf32> to vector<16x1xf32>
    %184 = tpu.reciprocal %183 {approx = true} : vector<16x1xf32> -> vector<16x1xf32>
    %185 = vector.broadcast %184 : vector<16x1xf32> to vector<16x16xf32>
    %186 = arith.mulf %181, %185 : vector<16x16xf32>
    %cst_107 = arith.constant dense<0.000000e+00> : vector<16x8xf32>
    %187 = tpu.matmul %186, %174, %cst_107 {dimension_numbers = #tpu.dot_dimension_numbers<[1], [0], [0], [1], [0, 0, 1, 1], [], []>} : vector<16x16xf32>, vector<16x8xf32>, vector<16x8xf32> -> vector<16x8xf32>
    %188 = vector.extract_strided_slice %13 {offsets = [24, 0], sizes = [8, 32], strides = [1, 1]} : vector<32x32xf32> to vector<8x32xf32>
    %cst_108 = arith.constant dense<0.000000e+00> : vector<16x32xf32>
    %189 = tpu.matmul %187, %188, %cst_108 {dimension_numbers = #tpu.dot_dimension_numbers<[1], [0], [0], [1], [0, 0, 1, 1], [], []>} : vector<16x8xf32>, vector<8x32xf32>, vector<16x32xf32> -> vector<16x32xf32>
    %190 = arith.addf %169, %189 : vector<16x32xf32>
    %c0_109 = arith.constant 0 : index
    %c0_110 = arith.constant 0 : index
    %c0_111 = arith.constant 0 : index
    %191 = vector.load %arg11[%c0_109, %c0_110, %c0_111] : memref<1x1x32xf32, #tpu.memory_space<vmem>>, vector<1x1x32xf32>
    %192 = vector.shape_cast %191 : vector<1x1x32xf32> to vector<1x32xf32>
    %193 = vector.broadcast %192 : vector<1x32xf32> to vector<16x32xf32>
    %194 = arith.addf %190, %193 : vector<16x32xf32>
    %c16_112 = arith.constant 16 : index
    %c0_113 = arith.constant 0 : index
    %195 = vector.load %arg23[%c16_112, %c0_113] : memref<32x32xf32, #tpu.memory_space<vmem>>, vector<16x32xf32>
    tpu.vector_store %arg23[%c16_112, %c0_113], %194 {strides = array<i32>} : memref<32x32xf32, #tpu.memory_space<vmem>>, vector<16x32xf32>,
    %c0_114 = arith.constant 0 : index
    %c0_115 = arith.constant 0 : index
    %196 = vector.load %arg23[%c0_114, %c0_115] : memref<32x32xf32, #tpu.memory_space<vmem>>, vector<32x32xf32>
    %197 = arith.addf %3, %196 : vector<32x32xf32>
    %c0_116 = arith.constant 0 : index
    %c0_117 = arith.constant 0 : index
    %c0_118 = arith.constant 0 : index
    %198 = vector.load %arg12[%c0_116, %c0_117, %c0_118] : memref<1x1x32xf32, #tpu.memory_space<vmem>>, vector<1x1x32xf32>
    %199 = vector.shape_cast %198 : vector<1x1x32xf32> to vector<1x32xf32>
    %c0_119 = arith.constant 0 : index
    %c0_120 = arith.constant 0 : index
    %c0_121 = arith.constant 0 : index
    %200 = vector.load %arg13[%c0_119, %c0_120, %c0_121] : memref<1x1x32xf32, #tpu.memory_space<vmem>>, vector<1x1x32xf32>
    %201 = vector.shape_cast %200 : vector<1x1x32xf32> to vector<1x32xf32>
    %cst_122 = arith.constant dense<0.000000e+00> : vector<32xf32>
    %202 = vector.multi_reduction <add>, %197, %cst_122 [1] : vector<32x32xf32> to vector<32xf32>
    %203 = vector.shape_cast %202 : vector<32xf32> to vector<32x1xf32>
    %cst_123 = arith.constant 3.200000e+01 : f32
    %204 = vector.broadcast %cst_123 : f32 to vector<32x1xf32>
    %205 = arith.divf %203, %204 : vector<32x1xf32>
    %206 = vector.broadcast %205 : vector<32x1xf32> to vector<32x32xf32>
    %207 = arith.subf %197, %206 : vector<32x32xf32>
    %208 = arith.mulf %207, %207 : vector<32x32xf32>
    %cst_124 = arith.constant dense<0.000000e+00> : vector<32xf32>
    %209 = vector.multi_reduction <add>, %208, %cst_124 [1] : vector<32x32xf32> to vector<32xf32>
    %210 = vector.shape_cast %209 : vector<32xf32> to vector<32x1xf32>
    %cst_125 = arith.constant 3.200000e+01 : f32
    %211 = vector.broadcast %cst_125 : f32 to vector<32x1xf32>
    %212 = arith.divf %210, %211 : vector<32x1xf32>
    %213 = vector.broadcast %205 : vector<32x1xf32> to vector<32x32xf32>
    %214 = arith.subf %197, %213 : vector<32x32xf32>
    %cst_126 = arith.constant 9.99999974E-6 : f32
    %215 = vector.broadcast %cst_126 : f32 to vector<32x1xf32>
    %216 = arith.addf %212, %215 : vector<32x1xf32>
    %217 = math.rsqrt %216 : vector<32x1xf32>
    %218 = vector.broadcast %217 : vector<32x1xf32> to vector<32x32xf32>
    %219 = arith.mulf %214, %218 : vector<32x32xf32>
    %220 = vector.broadcast %199 : vector<1x32xf32> to vector<32x32xf32>
    %221 = arith.mulf %219, %220 : vector<32x32xf32>
    %222 = vector.broadcast %201 : vector<1x32xf32> to vector<32x32xf32>
    %223 = arith.addf %221, %222 : vector<32x32xf32>
    %c0_127 = arith.constant 0 : index
    %c0_128 = arith.constant 0 : index
    %c0_129 = arith.constant 0 : index
    %224 = vector.load %arg14[%c0_127, %c0_128, %c0_129] : memref<1x32x64xf32, #tpu.memory_space<vmem>>, vector<1x32x64xf32>
    %225 = vector.shape_cast %224 : vector<1x32x64xf32> to vector<32x64xf32>
    %cst_130 = arith.constant dense<0.000000e+00> : vector<32x64xf32>
    %226 = tpu.matmul %223, %225, %cst_130 {dimension_numbers = #tpu.dot_dimension_numbers<[1], [0], [0], [1], [0, 0, 1, 1], [], []>} : vector<32x32xf32>, vector<32x64xf32>, vector<32x64xf32> -> vector<32x64xf32>
    %c0_131 = arith.constant 0 : index
    %c0_132 = arith.constant 0 : index
    %c0_133 = arith.constant 0 : index
    %227 = vector.load %arg15[%c0_131, %c0_132, %c0_133] : memref<1x1x64xf32, #tpu.memory_space<vmem>>, vector<1x1x64xf32>
    %228 = vector.shape_cast %227 : vector<1x1x64xf32> to vector<1x64xf32>
    %229 = vector.broadcast %228 : vector<1x64xf32> to vector<32x64xf32>
    %230 = arith.addf %226, %229 : vector<32x64xf32>
    %cst_134 = arith.constant 5.000000e-01 : f32
    %231 = vector.broadcast %cst_134 : f32 to vector<32x64xf32>
    %232 = arith.mulf %231, %230 : vector<32x64xf32>
    %cst_135 = arith.constant 4.471500e-02 : f32
    %233 = vector.broadcast %cst_135 : f32 to vector<32x64xf32>
    %234 = arith.mulf %233, %230 : vector<32x64xf32>
    %235 = arith.mulf %234, %230 : vector<32x64xf32>
    %236 = arith.mulf %235, %230 : vector<32x64xf32>
    %237 = arith.addf %230, %236 : vector<32x64xf32>
    %cst_136 = arith.constant 0.797884583 : f32
    %238 = vector.broadcast %cst_136 : f32 to vector<32x64xf32>
    %239 = arith.mulf %238, %237 : vector<32x64xf32>
    %240 = math.tanh %239 : vector<32x64xf32>
    %cst_137 = arith.constant 1.000000e+00 : f32
    %241 = vector.broadcast %cst_137 : f32 to vector<32x64xf32>
    %242 = arith.addf %241, %240 : vector<32x64xf32>
    %243 = arith.mulf %232, %242 : vector<32x64xf32>
    %c0_138 = arith.constant 0 : index
    %c0_139 = arith.constant 0 : index
    %c0_140 = arith.constant 0 : index
    %244 = vector.load %arg16[%c0_138, %c0_139, %c0_140] : memref<1x64x32xf32, #tpu.memory_space<vmem>>, vector<1x64x32xf32>
    %245 = vector.shape_cast %244 : vector<1x64x32xf32> to vector<64x32xf32>
    %cst_141 = arith.constant dense<0.000000e+00> : vector<32x32xf32>
    %246 = tpu.matmul %243, %245, %cst_141 {dimension_numbers = #tpu.dot_dimension_numbers<[1], [0], [0], [1], [0, 0, 1, 1], [], []>} : vector<32x64xf32>, vector<64x32xf32>, vector<32x32xf32> -> vector<32x32xf32>
    %c0_142 = arith.constant 0 : index
    %c0_143 = arith.constant 0 : index
    %c0_144 = arith.constant 0 : index
    %247 = vector.load %arg17[%c0_142, %c0_143, %c0_144] : memref<1x1x32xf32, #tpu.memory_space<vmem>>, vector<1x1x32xf32>
    %248 = vector.shape_cast %247 : vector<1x1x32xf32> to vector<1x32xf32>
    %249 = vector.broadcast %248 : vector<1x32xf32> to vector<32x32xf32>
    %250 = arith.addf %246, %249 : vector<32x32xf32>
    %251 = arith.addf %223, %250 : vector<32x32xf32>
    %c0_145 = arith.constant 0 : index
    %c0_146 = arith.constant 0 : index
    %c0_147 = arith.constant 0 : index
    %252 = vector.load %arg18[%c0_145, %c0_146, %c0_147] : memref<1x1x32xf32, #tpu.memory_space<vmem>>, vector<1x1x32xf32>
    %253 = vector.shape_cast %252 : vector<1x1x32xf32> to vector<1x32xf32>
    %c0_148 = arith.constant 0 : index
    %c0_149 = arith.constant 0 : index
    %c0_150 = arith.constant 0 : index
    %254 = vector.load %arg19[%c0_148, %c0_149, %c0_150] : memref<1x1x32xf32, #tpu.memory_space<vmem>>, vector<1x1x32xf32>
    %255 = vector.shape_cast %254 : vector<1x1x32xf32> to vector<1x32xf32>
    %cst_151 = arith.constant dense<0.000000e+00> : vector<32xf32>
    %256 = vector.multi_reduction <add>, %251, %cst_151 [1] : vector<32x32xf32> to vector<32xf32>
    %257 = vector.shape_cast %256 : vector<32xf32> to vector<32x1xf32>
    %cst_152 = arith.constant 3.200000e+01 : f32
    %258 = vector.broadcast %cst_152 : f32 to vector<32x1xf32>
    %259 = arith.divf %257, %258 : vector<32x1xf32>
    %260 = vector.broadcast %259 : vector<32x1xf32> to vector<32x32xf32>
    %261 = arith.subf %251, %260 : vector<32x32xf32>
    %262 = arith.mulf %261, %261 : vector<32x32xf32>
    %cst_153 = arith.constant dense<0.000000e+00> : vector<32xf32>
    %263 = vector.multi_reduction <add>, %262, %cst_153 [1] : vector<32x32xf32> to vector<32xf32>
    %264 = vector.shape_cast %263 : vector<32xf32> to vector<32x1xf32>
    %cst_154 = arith.constant 3.200000e+01 : f32
    %265 = vector.broadcast %cst_154 : f32 to vector<32x1xf32>
    %266 = arith.divf %264, %265 : vector<32x1xf32>
    %267 = vector.broadcast %259 : vector<32x1xf32> to vector<32x32xf32>
    %268 = arith.subf %251, %267 : vector<32x32xf32>
    %cst_155 = arith.constant 9.99999974E-6 : f32
    %269 = vector.broadcast %cst_155 : f32 to vector<32x1xf32>
    %270 = arith.addf %266, %269 : vector<32x1xf32>
    %271 = math.rsqrt %270 : vector<32x1xf32>
    %272 = vector.broadcast %271 : vector<32x1xf32> to vector<32x32xf32>
    %273 = arith.mulf %268, %272 : vector<32x32xf32>
    %274 = vector.broadcast %253 : vector<1x32xf32> to vector<32x32xf32>
    %275 = arith.mulf %273, %274 : vector<32x32xf32>
    %276 = vector.broadcast %255 : vector<1x32xf32> to vector<32x32xf32>
    %277 = arith.addf %275, %276 : vector<32x32xf32>
    %c0_156 = arith.constant 0 : index
    %c0_157 = arith.constant 0 : index
    %278 = vector.load %arg21[%c0_156, %c0_157] : memref<32x32xf32, #tpu.memory_space<vmem>>, vector<32x32xf32>
    tpu.vector_store %arg21[%c0_156, %c0_157], %277 {strides = array<i32>} : memref<32x32xf32, #tpu.memory_space<vmem>>, vector<32x32xf32>,
    %c1_i32 = arith.constant 1 : i32
    %279 = arith.cmpi eq, %arg0, %c1_i32 : i32
    %280 = arith.extui %279 : i1 to i32
    %c0_i32_158 = arith.constant 0 : i32
    %281 = arith.cmpi ne, %280, %c0_i32_158 : i32
    scf.if %281 {
      %c0_159 = arith.constant 0 : index
      %c0_160 = arith.constant 0 : index
      %282 = vector.load %arg20[%c0_159, %c0_160] : memref<32x32xf32, #tpu.memory_space<vmem>>, vector<32x32xf32>
      tpu.vector_store %arg20[%c0_159, %c0_160], %277 {strides = array<i32>} : memref<32x32xf32, #tpu.memory_space<vmem>>, vector<32x32xf32>,
    } else {
    }
    return
  }
  func.func @transform_0(%arg0: i32) -> (i32, i32, i32) {
    %c0_i32 = arith.constant 0 : i32
    %c0_i32_0 = arith.constant 0 : i32
    %c0_i32_1 = arith.constant 0 : i32
    %c0_i32_2 = arith.constant 0 : i32
    return %c0_i32, %c0_i32_0, %c0_i32_1 : i32, i32, i32
  }
  func.func @transform_1(%arg0: i32) -> (i32, i32, i32) {
    %c0_i32 = arith.constant 0 : i32
    %c0_i32_0 = arith.constant 0 : i32
    %c0_i32_1 = arith.constant 0 : i32
    %c0_i32_2 = arith.constant 0 : i32
    return %c0_i32, %c0_i32_0, %c0_i32_1 : i32, i32, i32
  }
  func.func @transform_2(%arg0: i32) -> (i32, i32, i32) {
    %c0_i32 = arith.constant 0 : i32
    %c0_i32_0 = arith.constant 0 : i32
    %c0_i32_1 = arith.constant 0 : i32
    %c0_i32_2 = arith.constant 0 : i32
    return %c0_i32, %c0_i32_0, %c0_i32_1 : i32, i32, i32
  }
  func.func @transform_3(%arg0: i32) -> (i32, i32, i32) {
    %c0_i32 = arith.constant 0 : i32
    %c0_i32_0 = arith.constant 0 : i32
    %c0_i32_1 = arith.constant 0 : i32
    %c0_i32_2 = arith.constant 0 : i32
    return %c0_i32, %c0_i32_0, %c0_i32_1 : i32, i32, i32
  }
  func.func @transform_4(%arg0: i32) -> (i32, i32, i32) {
    %c0_i32 = arith.constant 0 : i32
    %c0_i32_0 = arith.constant 0 : i32
    %c0_i32_1 = arith.constant 0 : i32
    %c0_i32_2 = arith.constant 0 : i32
    return %c0_i32, %c0_i32_0, %c0_i32_1 : i32, i32, i32
  }
  func.func @transform_5(%arg0: i32) -> (i32, i32) {
    %c0_i32 = arith.constant 0 : i32
    %c0_i32_0 = arith.constant 0 : i32
    %c0_i32_1 = arith.constant 0 : i32
    return %c0_i32, %c0_i32_0 : i32, i32
  }
  func.func @transform_6(%arg0: i32) -> (i32, i32) {
    %c0_i32 = arith.constant 0 : i32
    %c0_i32_0 = arith.constant 0 : i32
    %c0_i32_1 = arith.constant 0 : i32
    return %c0_i32, %c0_i32_0 : i32, i32
  }
  func.func @transform_7(%arg0: i32) -> (i32, i32, i32) {
    %c0_i32 = arith.constant 0 : i32
    %c0_i32_0 = arith.constant 0 : i32
    %c0_i32_1 = arith.constant 0 : i32
    return %arg0, %c0_i32, %c0_i32_0 : i32, i32, i32
  }
  func.func @transform_8(%arg0: i32) -> (i32, i32, i32) {
    %c0_i32 = arith.constant 0 : i32
    %c0_i32_0 = arith.constant 0 : i32
    %c0_i32_1 = arith.constant 0 : i32
    return %arg0, %c0_i32, %c0_i32_0 : i32, i32, i32
  }
  func.func @transform_9(%arg0: i32) -> (i32, i32, i32) {
    %c0_i32 = arith.constant 0 : i32
    %c0_i32_0 = arith.constant 0 : i32
    %c0_i32_1 = arith.constant 0 : i32
    return %arg0, %c0_i32, %c0_i32_0 : i32, i32, i32
  }
  func.func @transform_10(%arg0: i32) -> (i32, i32, i32) {
    %c0_i32 = arith.constant 0 : i32
    %c0_i32_0 = arith.constant 0 : i32
    %c0_i32_1 = arith.constant 0 : i32
    return %arg0, %c0_i32, %c0_i32_0 : i32, i32, i32
  }
  func.func @transform_11(%arg0: i32) -> (i32, i32, i32) {
    %c0_i32 = arith.constant 0 : i32
    %c0_i32_0 = arith.constant 0 : i32
    %c0_i32_1 = arith.constant 0 : i32
    return %arg0, %c0_i32, %c0_i32_0 : i32, i32, i32
  }
  func.func @transform_12(%arg0: i32) -> (i32, i32, i32) {
    %c0_i32 = arith.constant 0 : i32
    %c0_i32_0 = arith.constant 0 : i32
    %c0_i32_1 = arith.constant 0 : i32
    return %arg0, %c0_i32, %c0_i32_0 : i32, i32, i32
  }
  func.func @transform_13(%arg0: i32) -> (i32, i32, i32) {
    %c0_i32 = arith.constant 0 : i32
    %c0_i32_0 = arith.constant 0 : i32
    %c0_i32_1 = arith.constant 0 : i32
    return %arg0, %c0_i32, %c0_i32_0 : i32, i32, i32
  }
  func.func @transform_14(%arg0: i32) -> (i32, i32, i32) {
    %c0_i32 = arith.constant 0 : i32
    %c0_i32_0 = arith.constant 0 : i32
    %c0_i32_1 = arith.constant 0 : i32
    return %arg0, %c0_i32, %c0_i32_0 : i32, i32, i32
  }
  func.func @transform_15(%arg0: i32) -> (i32, i32, i32) {
    %c0_i32 = arith.constant 0 : i32
    %c0_i32_0 = arith.constant 0 : i32
    %c0_i32_1 = arith.constant 0 : i32
    return %arg0, %c0_i32, %c0_i32_0 : i32, i32, i32
  }
  func.func @transform_16(%arg0: i32) -> (i32, i32, i32) {
    %c0_i32 = arith.constant 0 : i32
    %c0_i32_0 = arith.constant 0 : i32
    %c0_i32_1 = arith.constant 0 : i32
    return %arg0, %c0_i32, %c0_i32_0 : i32, i32, i32
  }
  func.func @transform_17(%arg0: i32) -> (i32, i32, i32) {
    %c0_i32 = arith.constant 0 : i32
    %c0_i32_0 = arith.constant 0 : i32
    %c0_i32_1 = arith.constant 0 : i32
    return %arg0, %c0_i32, %c0_i32_0 : i32, i32, i32
  }
  func.func @transform_18(%arg0: i32) -> (i32, i32, i32) {
    %c0_i32 = arith.constant 0 : i32
    %c0_i32_0 = arith.constant 0 : i32
    %c0_i32_1 = arith.constant 0 : i32
    return %arg0, %c0_i32, %c0_i32_0 : i32, i32, i32
  }
  func.func @transform_19(%arg0: i32) -> (i32, i32) {
    %c0_i32 = arith.constant 0 : i32
    %c0_i32_0 = arith.constant 0 : i32
    %c0_i32_1 = arith.constant 0 : i32
    return %c0_i32, %c0_i32_0 : i32, i32
  }
}

</mosaic_0001>

<bundles_post_ra>
// kernel: graphcodebert_forward.1
= control target key start
LH: loop header
LB: loop body
LE: loop exit
PB: predicated region body
PF: predicated region fallthrough
CT: control target
= control target key end

     0   :  { %s5471_s0 = inlined_call_operand.vmem [shape: f32[2,16,1], index: 0, kind: input, shape index: {}]   ;;  %s5472_s1 = inlined_call_operand.vmem [shape: f32[2,1,16], index: 1, kind: input, shape index: {}]   ;;  %s5473_s2 = inlined_call_operand.vmem [shape: f32[2,16,16], index: 2, kind: input, shape index: {}]   ;;  %s5474_s3 = inlined_call_operand.vmem [shape: f32[2,16,32], index: 3, kind: input, shape index: {}]   ;;  %s5475_s4 = inlined_call_operand.vmem [shape: f32[2,16,32], index: 4, kind: input, shape index: {}]   ;;  %s5476_s5 = inlined_call_operand.vmem [shape: f32[1,32], index: 5, kind: input, shape index: {}]   ;;  %s5477_s6 = inlined_call_operand.vmem [shape: f32[1,32], index: 6, kind: input, shape index: {}]   ;;  %s5478_s7 = inlined_call_operand.vmem [shape: f32[2,32,96], index: 7, kind: input, shape index: {}]   ;;  %s5479_s8 = inlined_call_operand.vmem [shape: f32[2,1,96], index: 8, kind: input, shape index: {}]   ;;  %s5480_s9 = inlined_call_operand.vmem [shape: f32[2,32,32], index: 9, kind: input, shape index: {}]   ;;  %s5481_s10 = inlined_call_operand.vmem [shape: f32[2,1,32], index: 10, kind: input, shape index: {}]   ;;  %s5482_s11 = inlined_call_operand.vmem [shape: f32[2,1,32], index: 11, kind: input, shape index: {}]   ;;  %s5483_s12 = inlined_call_operand.vmem [shape: f32[2,1,32], index: 12, kind: input, shape index: {}]   ;;  %s5484_s13 = inlined_call_operand.vmem [shape: f32[2,32,64], index: 13, kind: input, shape index: {}]   ;;  %s5485_s14 = inlined_call_operand.vmem [shape: f32[2,1,64], index: 14, kind: input, shape index: {}]   ;;  %s5486_s15 = inlined_call_operand.vmem [shape: f32[2,64,32], index: 15, kind: input, shape index: {}]   ;;  %s5487_s16 = inlined_call_operand.vmem [shape: f32[2,1,32], index: 16, kind: input, shape index: {}]   ;;  %s5488_s17 = inlined_call_operand.vmem [shape: f32[2,1,32], index: 17, kind: input, shape index: {}]   ;;  %s5489_s18 = inlined_call_operand.vmem [shape: f32[2,1,32], index: 18, kind: input, shape index: {}]   ;;  %s5490_s19 = inlined_call_operand.vmem [shape: f32[32,32], index: 19, kind: output, shape index: {}]  }
   0x1   :  { %5498 = sst [smem:[#allocation8_spill]] %s5471_s0  ;;  %s4857_s0 = smov 0  }
   0x2   :  { %5499 = sst [smem:[#allocation9_spill]] %s5472_s1 }
   0x3   :  { %5500 = sst [smem:[#allocation10_spill]] %s5473_s2 }
   0x4   :  { %5501 = sst [smem:[#allocation11_spill]] %s5474_s3 }
   0x5   :  { %5502 = sst [smem:[#allocation12_spill]] %s5476_s5 }
   0x6   :  { %5503 = sst [smem:[#allocation13_spill]] %s5477_s6 }
   0x7   :  { %5504 = sst [smem:[#allocation14_spill]] %s5478_s7 }
   0x8   :  { %5505 = sst [smem:[#allocation15_spill]] %s5480_s9 }
   0x9   :  { %5506 = sst [smem:[#allocation16_spill]] %s5490_s19 }
   0xa LB: > { %5507 = sst [smem:[#allocation6_spill]] %s4743_s0  ;;  %s4863_s30 = sadd.s32 4294967295, %s4743_s0   ;;  %s4743_s0 = sphi %s4857_s0, %s29_s0  }
   0xb   : > { %p4143_p0 = scmp.ge.s32.totalorder %s4743_s0, 1  ;;  %p626_p1 = scmp.lt.s32.totalorder %s4743_s0, 3 }
   0xd   : > { %p627_p2 = pnand %p4143_p0, %p626_p1 }
   0xf   : > { %630 = sbr.rel (%p627_p2) target bundleno = 5717 (0x1655), region = 96 }
  0x14   : > { %p716_p3 = scmp.lt.s32.totalorder %s4863_s30, 1  ;;  %s5508_s7 = sld [smem:[#allocation14_spill]] }
  0x15   : > { %s5509_s9 = sld [smem:[#allocation15_spill]]  ;;  %p4152_p4 = scmp.ne.s32.totalorder %s4863_s30, 0 }
  0x16   : > { %s4869_s20 = scalar_select %p716_p3, %s4863_s30, 1 }
  0x17   : > { %s5511_s28 = sld [smem:[#allocation8_spill]] (!%p4152_p4) }
  0x18   : > { %s4264_s21 = sshll.u32 %s4869_s20, 5  ;;  %s5512_s19 = sld [smem:[#allocation10_spill]] (!%p4152_p4) }
  0x19   : > { %763 = sbr.rel (%p4152_p4) target bundleno = 840 (0x348), region = 100  ;;  %s5513_s3 = sld [smem:[#allocation9_spill]] (!%p4152_p4) }
  0x1a   : > { %s4879_s25 = scalar_lea.vmem %s5508_s7, %s4264_s21  ;;  %s4901_s7 = scalar_lea.vmem %s5484_s13, %s4264_s21 }
  0x1b   : > { %s4884_s27 = scalar_lea.vmem %s5509_s9, %s4264_s21  ;;  %s745_s9 = scalar_lea.vmem %s5485_s14, %s4869_s20 }
  0x1c   : > { %5510 = sst [smem:[#allocation7_spill]] %s4884_s27  ;;  %s4267_s27 = sshll.u32 %s4869_s20, 6 }
  0x1d   : > { %s4911_s0 = scalar_lea.vmem %s5486_s15, %s4267_s27  ;;  %s5514_s6 = sld [smem:[#allocation11_spill]] (!%p4152_p4) }
  0x1e   : > { %v4929_v0 = vld [vmem:[%s5511_s28 + $0x8] sm:$0xff]  ;;  %v764_v1 = vld [vmem:[%s5511_s28] sm:$0xff]  ;;  %v4745_v2 = vmov 0   ;;  %v4161_v4 = vld [vmem:[%s5511_s28 + $0x18] sm:$0xff]  ;;  %vm775_vm0 = vcmask 130048   ;;  %vm915_vm1 = vcmask 261120  }
  0x1f   : > { %4629 = vset.pattern.permute.xlu1 %v4745_v2  ;;  %4628 = vset.pattern.permute.xlu0 %v4745_v2  ;;  %v767_v3 = vld [vmem:[%s5512_s19] sm:$0xff]  ;;  %v4160_v5 = vld [vmem:[%s5511_s28 + $0x10] sm:$0xff]  ;;  %v768_v7 = vld [vmem:[%s5512_s19 + $0x8] sm:$0xff]  ;;  %v891_v35 = vsub.f32 1.0, %v764_v1  ;;  %v1092_v39 = vsub.f32 1.0, %v4161_v4  ;;  %v892_v40 = vsub.f32 1.0, %v4929_v0 }
  0x20   : > { %785 = vperm.xlu1 %4629, %v4929_v0   ;;  %780 = vperm.xlu0 %4628, %v764_v1   ;;  %v4153_v6 = vadd.f32 -1.0, %v767_v3  ;;  %v4154_v8 = vadd.f32 -1.0, %v768_v7  ;;  %v4163_v11 = vld [vmem:[%s5512_s19 + $0x10] sm:$0xff]  ;;  %v4164_v12 = vld [vmem:[%s5512_s19 + $0x18] sm:$0xff]  ;;  %v4155_v17 = vld [vmem:[%s5513_s3] ss:$0 sm:$0xff] }
  0x21   : > { %v4167_v13 = vadd.f32 -1.0, %v4163_v11  ;;  %v4168_v14 = vadd.f32 -1.0, %v4164_v12  ;;  %v4169_v22 = vld [vmem:[%s5513_s3 + $0x1] ss:$0 sm:$0xff]  ;;  %v1091_v36 = vsub.f32 1.0, %v4160_v5  ;;  %v910_v2 = vld [vmem:[%s5475_s4 + $0x8] sm:$0xff] }
  0x22   : > { %v773_v9 = vmul.f32 1e+09, %v4153_v6  ;;  %v774_v10 = vmul.f32 1e+09, %v4154_v8  ;;  %v909_v8 = vld [vmem:[%s5475_s4] sm:$0xff]  ;;  %s5515_s24 = sld [smem:[#allocation12_spill]] }
  0x23   : > { %v974_v15 = vmul.f32 1e+09, %v4167_v13  ;;  %v975_v16 = vmul.f32 1e+09, %v4168_v14  ;;  %v770_v37 = vld [vmem:[%s5514_s6 + $0x8] sm:$0xff]  ;;  %v769_v38 = vld [vmem:[%s5514_s6] sm:$0xff] }
  0x24   : > { %985 = vperm.xlu1 %4629, %v4161_v4   ;;  %980 = vperm.xlu0 %4628, %v4160_v5   ;;  %776 = vst.msk [vmem:[#allocation5] sm:$0xff] %vm775_vm0, %v773_v9  ;;  %777 = vst.msk [vmem:[#allocation5 + $0x8] sm:$0xff] %vm775_vm0, %v774_v10  ;;  %v4166_v41 = vld [vmem:[%s5514_s6 + $0x18] sm:$0xff]  ;;  %v4165_v42 = vld [vmem:[%s5514_s6 + $0x10] sm:$0xff]  ;;  %s5516_s29 = sld [smem:[#allocation13_spill]] }
  0x25   : > { %976 = vst.msk [vmem:[#allocation5 + $0x10] sm:$0xff] %vm775_vm0, %v974_v15  ;;  %977 = vst.msk [vmem:[#allocation5 + $0x18] sm:$0xff] %vm775_vm0, %v975_v16  ;;  %4392 = vmatprep.subr.mxu0 %v770_v37  ;;  %4399 = vmatprep.subr.mxu1 %v4166_v41 }
  0x26   : > { %4393 = vmatpush3.msra.mxu0 %v770_v37  ;;  %4400 = vmatpush3.msra.mxu1 %v4166_v41 }
  0x27   : > { %4394 = vmatprep.subr.mxu0 %v769_v38  ;;  %4401 = vmatprep.subr.mxu1 %v4165_v42 }
  0x28   : > { %4395 = vmatpush3.msra.mxu0 %v769_v38  ;;  %4402 = vmatpush3.msra.mxu1 %v4165_v42 }
  0x9b   : > { %v4960_v18 = vpop.permute.xlu1 %785  ;;  %v4962_v19 = vpop.permute.xlu0 %780 }
  0x9c   : > { %v795_v20 = vmul.f32 %v4155_v17, %v4960_v18  ;;  %v794_v21 = vmul.f32 %v4155_v17, %v4962_v19 }
  0x9e   : > { %v796_v23 = vmul.f32 %v794_v21, %v767_v3  ;;  %v797_v24 = vmul.f32 %v795_v20, %v768_v7 }
  0x9f   : > { %v4969_v25 = vpop.permute.xlu1 %985  ;;  %v4971_v26 = vpop.permute.xlu0 %980 }
  0xa0   : > { %v995_v27 = vmul.f32 %v4169_v22, %v4969_v25  ;;  %v994_v28 = vmul.f32 %v4169_v22, %v4971_v26  ;;  %v798_v29 = vsel %vm775_vm0, %v796_v23, 0.0  ;;  %v801_v30 = vsel %vm775_vm0, %v797_v24, 0.0 }
  0xa1   : > { %799 = vadd.xlane.f32.xlu0 %v798_v29 }
  0xa2   : > { %v996_v31 = vmul.f32 %v4163_v11, %v994_v28  ;;  %v997_v33 = vmul.f32 %v4164_v12, %v995_v27 }
  0xa4   : > { %v998_v32 = vsel %vm775_vm0, %v996_v31, 0.0  ;;  %v1001_v34 = vsel %vm775_vm0, %v997_v33, 0.0 }
  0xa5   : > { %802 = vadd.xlane.f32.xlu0 %v801_v30  ;;  %999 = vadd.xlane.f32.xlu1 %v998_v32 }
  0xa9   : > { %1002 = vadd.xlane.f32.xlu0 %v1001_v34 }
  0xb6   : > { %895 = vperm.xlu1 %4629, %v891_v35  }
  0xba   : > { %1095 = vperm.xlu1 %4629, %v1091_v36  }
  0xbe   : > { %1100 = vperm.xlu1 %4629, %v1092_v39  }
  0xbf   : > { %900 = vperm.xlu0 %4628, %v892_v40  }
 0x12a   : > { %v800_v43 = vpop.xlane.xlu0 %799 }
 0x12b   : > { %v804_v44 = vadd.f32 1e-10, %v800_v43 }
 0x12d   : > { %4630 = vrcp.f32 %v804_v44 }
 0x12e   : > { %v1000_v45 = vpop.xlane.xlu1 %999  ;;  %v803_v46 = vpop.xlane.xlu0 %802 }
 0x12f   : > { %v1004_v47 = vadd.f32 1e-10, %v1000_v45  ;;  %v805_v48 = vadd.f32 1e-10, %v803_v46 }
 0x131   : > { %4632 = vrcp.f32 %v1004_v47 }
 0x132   : > { %4634 = vrcp.f32 %v805_v48  ;;  %v1003_v49 = vpop.xlane.xlu0 %1002  ;;  %v896_v59 = vpop.permute.xlu1 %895 }
 0x133   : > { %v1005_v50 = vadd.f32 1e-10, %v1003_v49  ;;  %v903_v3 = vmul.f32 %v896_v59, %v769_v38 }
 0x135   : > { %4636 = vrcp.f32 %v1005_v50 }
 0x136   : > { %v1096_v60 = vpop.permute.xlu1 %1095 }
 0x137   : > { %v1103_v13 = vmul.f32 %v4165_v42, %v1096_v60  ;;  %v4158_v60 = vld [vmem:[%s5515_s24] ss:$0 sm:$0xff] }
 0x13a   : > { %v4631_v51 = vpop.eup %4630  ;;  %v901_v61 = vpop.permute.xlu0 %900 }
 0x13b   : > { %v808_v52 = vmul.f32 %v4631_v51, %v796_v23  ;;  %v904_v63 = vmul.f32 %v901_v61, %v770_v37  ;;  %v1101_v7 = vpop.permute.xlu1 %1100  ;;  %v4173_v23 = vld [vmem:[%s5475_s4 + $0x18] sm:$0xff] }
 0x13c   : > { %v1104_v15 = vmul.f32 %v4166_v41, %v1101_v7 }
 0x13d   : > { %4396 = vmatprep.mubr.msk.f32.mxu0 %vm775_vm0, %v808_v52 }
 0x13e   : > { %v4633_v53 = vpop.eup %4632 }
 0x13f   : > { %v4635_v54 = vpop.eup %4634  ;;  %v1008_v55 = vmul.f32 %v4633_v53, %v996_v31 }
 0x140   : > { %v809_v56 = vmul.f32 %v4635_v54, %v797_v24 }
 0x141   : > { %4403 = vmatprep.mubr.msk.f32.mxu1 %vm775_vm0, %v1008_v55 }
 0x142   : > { %v4637_v57 = vpop.eup %4636  ;;  %4397 = vmatmul.mubr.msk.f32.vlgmr.msra.gmra.mxu0 %vm775_vm0, %v809_v56 }
 0x143   : > { %v1009_v58 = vmul.f32 %v4637_v57, %v997_v33 }
 0x145   : > { %4404 = vmatmul.mubr.msk.f32.vlgmr.msra.gmra.mxu1 %vm775_vm0, %v1009_v58 }
 0x202   : > { %v4398_v62 = vpop.f32.mrf.mxu0 }
 0x203   : > { %v906_v0 = vmul.f32 %v4398_v62, %v4960_v18  ;;  %v4172_v18 = vld [vmem:[%s5475_s4 + $0x10] sm:$0xff] }
 0x204   : > { %v882_v1 = vpop.f32.mrf.mxu0 }
 0x205   : > { %v908_v4 = vadd.f32 %v906_v0, %v904_v63  ;;  %v905_v5 = vmul.f32 %v882_v1, %v4962_v19  ;;  %v4405_v6 = vpop.f32.mrf.mxu1  ;;  %v4159_v63 = vld [vmem:[%s5516_s29] ss:$0 sm:$0xff] }
 0x206   : > { %v1106_v10 = vmul.f32 %v4405_v6, %v4969_v25 }
 0x207   : > { %v907_v9 = vadd.f32 %v905_v5, %v903_v3  ;;  %v1082_v11 = vpop.f32.mrf.mxu1  ;;  %v912_v12 = vadd.f32 %v910_v2, %v908_v4 }
 0x208   : > { %v1105_v14 = vmul.f32 %v1082_v11, %v4971_v26  ;;  %v1108_v20 = vadd.f32 %v1106_v10, %v1104_v15 }
 0x209   : > { %v919_v16 = vsel %vm915_vm1, %v912_v12, 0.0  ;;  %v911_v17 = vadd.f32 %v909_v8, %v907_v9 }
 0x20a   : > { %v1107_v19 = vadd.f32 %v1105_v14, %v1103_v13  ;;  %920 = vadd.xlane.f32.xlu1 %v919_v16  ;;  %v1113_v25 = vadd.f32 %v4173_v23, %v1108_v20 }
 0x20b   : > { %v916_v21 = vsel %vm915_vm1, %v911_v17, 0.0 }
 0x20c   : > { %917 = vadd.xlane.f32.xlu0 %v916_v21  ;;  %v1112_v22 = vadd.f32 %v4172_v18, %v1107_v19  ;;  %v1119_v26 = vsel %vm915_vm1, %v1113_v25, 0.0 }
 0x20e   : > { %v1116_v24 = vsel %vm915_vm1, %v1112_v22, 0.0 }
 0x210   : > { %1117 = vadd.xlane.f32.xlu0 %v1116_v24 }
 0x214   : > { %1120 = vadd.xlane.f32.xlu0 %v1119_v26 }
 0x293   : > { %v921_v27 = vpop.xlane.xlu1 %920 }
 0x294   : > { %v924_v28 = vmul.f32 0.03125, %v921_v27 }
 0x295   : > { %v918_v29 = vpop.xlane.xlu0 %917 }
 0x296   : > { %v926_v30 = vsub.f32 %v912_v12, %v924_v28  ;;  %v923_v31 = vmul.f32 0.03125, %v918_v29 }
 0x298   : > { %v925_v32 = vsub.f32 %v911_v17, %v923_v31  ;;  %v928_v33 = vmul.f32 %v926_v30, %v926_v30 }
 0x299   : > { %v1118_v34 = vpop.xlane.xlu0 %1117 }
 0x29a   : > { %v1122_v35 = vmul.f32 0.03125, %v1118_v34  ;;  %v932_v36 = vsel %vm915_vm1, %v928_v33, 0.0  ;;  %v927_v37 = vmul.f32 %v925_v32, %v925_v32 }
 0x29b   : > { %933 = vadd.xlane.f32.xlu0 %v932_v36 }
 0x29c   : > { %v1124_v38 = vsub.f32 %v1112_v22, %v1122_v35  ;;  %v929_v39 = vsel %vm915_vm1, %v927_v37, 0.0 }
 0x29d   : > { %930 = vadd.xlane.f32.xlu1 %v929_v39  ;;  %v1121_v40 = vpop.xlane.xlu0 %1120 }
 0x29e   : > { %v1123_v41 = vmul.f32 0.03125, %v1121_v40  ;;  %v1126_v42 = vmul.f32 %v1124_v38, %v1124_v38 }
 0x2a0   : > { %v1125_v43 = vsub.f32 %v1113_v25, %v1123_v41  ;;  %v1128_v44 = vsel %vm915_vm1, %v1126_v42, 0.0 }
 0x2a1   : > { %1129 = vadd.xlane.f32.xlu1 %v1128_v44 }
 0x2a2   : > { %v1127_v45 = vmul.f32 %v1125_v43, %v1125_v43 }
 0x2a4   : > { %v1131_v46 = vsel %vm915_vm1, %v1127_v45, 0.0 }
 0x2a5   : > { %1132 = vadd.xlane.f32.xlu0 %v1131_v46 }
 0x324   : > { %v934_v47 = vpop.xlane.xlu0 %933 }
 0x325   : > { %v936_v48 = vmul.f32 0.03125, %v934_v47 }
 0x326   : > { %v931_v49 = vpop.xlane.xlu1 %930 }
 0x327   : > { %v938_v50 = vadd.f32 1e-05, %v936_v48  ;;  %v935_v51 = vmul.f32 0.03125, %v931_v49 }
 0x329   : > { %4638 = vrsqrt.f32 %v938_v50  ;;  %v937_v52 = vadd.f32 1e-05, %v935_v51 }
 0x32a   : > { %v1130_v53 = vpop.xlane.xlu1 %1129 }
 0x32b   : > { %4640 = vrsqrt.f32 %v937_v52  ;;  %v1134_v54 = vmul.f32 0.03125, %v1130_v53 }
 0x32d   : > { %v1136_v55 = vadd.f32 1e-05, %v1134_v54 }
 0x32e   : > { %v1133_v56 = vpop.xlane.xlu0 %1132 }
 0x32f   : > { %4642 = vrsqrt.f32 %v1136_v55  ;;  %v1135_v57 = vmul.f32 0.03125, %v1133_v56 }
 0x331   : > { %v1137_v58 = vadd.f32 1e-05, %v1135_v57 }
 0x333   : > { %4644 = vrsqrt.f32 %v1137_v58 }
 0x336   : > { %v4639_v59 = vpop.eup %4638 }
 0x337   : > { %v942_v61 = vmul.f32 %v4639_v59, %v926_v30 }
 0x338   : > { %v4641_v62 = vpop.eup %4640 }
 0x339   : > { %v950_v0 = vmul.f32 %v4158_v60, %v942_v61  ;;  %v941_v1 = vmul.f32 %v4641_v62, %v925_v32 }
 0x33b   : > { %v958_v2 = vadd.f32 %v4159_v63, %v950_v0  ;;  %v949_v3 = vmul.f32 %v4158_v60, %v941_v1 }
 0x33c   : > { %v4643_v4 = vpop.eup %4642 }
 0x33d   : > { %960 = vst.msk [vmem:[#allocation2 + $0x8] sm:$0xff] %vm915_vm1, %v958_v2  ;;  %v957_v5 = vadd.f32 %v4159_v63, %v949_v3  ;;  %v1140_v6 = vmul.f32 %v4643_v4, %v1124_v38 }
 0x33f   : > { %959 = vst.msk [vmem:[#allocation2] sm:$0xff] %vm915_vm1, %v957_v5  ;;  %v1148_v7 = vmul.f32 %v4158_v60, %v1140_v6 }
 0x340   : > { %v4645_v8 = vpop.eup %4644 }
 0x341   : > { %v1156_v9 = vadd.f32 %v4159_v63, %v1148_v7  ;;  %v1141_v10 = vmul.f32 %v4645_v8, %v1125_v43 }
 0x343   : > { %1158 = vst.msk [vmem:[#allocation2 + $0x10] sm:$0xff] %vm915_vm1, %v1156_v9  ;;  %v1149_v11 = vmul.f32 %v4158_v60, %v1141_v10 }
 0x345   : > { %v1157_v12 = vadd.f32 %v4159_v63, %v1149_v11 }
 0x347   : > { %1159 = vst.msk [vmem:[#allocation2 + $0x18] sm:$0xff] %vm915_vm1, %v1157_v12 }
 0x348 PF: > { %v1167_v13 = vld [vmem:[%s4879_s25 + $0x18] sm:$0xff]  ;;  %v1166_v14 = vld [vmem:[%s4879_s25 + $0x10] sm:$0xff]  ;;  %vm1175_vm2 = vcmask 261120   ;;  %v5032_v15 = vld [vmem:[#allocation2] sm:$0xff]  ;;  %s5517_s21 = scalar_lea.vmem %s5479_s8, %s4869_s20  ;;  %vm1273_vm3 = vcmask 785408   ;;  %vm1294_vm4 = vcmask 64512  }
 0x349   : > { %4406 = vmatprep.subr.mxu0 %v1167_v13  ;;  %v1165_v16 = vld [vmem:[%s4879_s25 + $0x8] sm:$0xff]  ;;  %4414 = vmatprep.mubr.msk.f32.mxu0 %vm1175_vm2, %v5032_v15  ;;  %v1164_v17 = vld [vmem:[%s4879_s25] sm:$0xff]  ;;  %s4746_s25 = smov 88   ;;  %s4747_s24 = smov 120   ;;  %vm1380_vm5 = vcmask 130048   ;;  %vm3816_vm6 = vcmask 523264  }
 0x34a   : > { %4407 = vmatpush3.msra.mxu0 %v1167_v13  ;;  %v1161_v18 = vld [vmem:[#allocation2 + $0x8] sm:$0xff]  ;;  %v4176_v19 = vld [vmem:[%s5517_s21] ss:$0 sm:$0xff]  ;;  %v1162_v20 = vld [vmem:[#allocation2 + $0x10] sm:$0xff]  ;;  %s4748_s26 = smov 96   ;;  %s4749_s27 = smov 56  }
 0x34b   : > { %4408 = vmatprep.subr.mxu0 %v1166_v14  ;;  %v5076_v38 = vld [vmem:[#allocation5 + $0x8] sm:$0xff]  ;;  %v5078_v40 = vld [vmem:[#allocation5] sm:$0xff]  ;;  %s4750_s29 = smov 80   ;;  %s4751_s2 = smov 112  }
 0x34c   : > { %4409 = vmatpush3.msra.mxu0 %v1166_v14  ;;  %s5518_s22 = sld [smem:[#allocation7_spill]]  ;;  %s4752_s21 = smov 64  }
 0x34d   : > { %4410 = vmatprep.subr.mxu0 %v1165_v16  ;;  %s4753_s5 = smov 72   ;;  %s4754_s23 = smov 104  }
 0x34e   : > { %4411 = vmatpush3.msra.mxu0 %v1165_v16  ;;  %v1163_v21 = vld [vmem:[#allocation2 + $0x18] sm:$0xff]  ;;  %s4755_s1 = smov 48   ;;  %p4261_p5 = scmp.ne.s32.totalorder %s4863_s30, 1 }
 0x34f   : > { %4412 = vmatprep.subr.mxu0 %v1164_v17 }
 0x350   : > { %4413 = vmatpush3.msra.mxu0 %v1164_v17 }
 0x351   : > { %4415 = vmatmul.mubr.msk.f32.vlgmr.msra.gmra.mxu0 %vm1175_vm2, %v1161_v18 }
 0x352   : > { %4417 = vmatprep.mubr.msk.f32.mxu0 %vm1175_vm2, %v1162_v20  ;;  %v5109_v62 = vld [vmem:[%s5518_s22 + $0x8] sm:$0xff] }
 0x355   : > { %4418 = vmatmul.mubr.msk.f32.gmra.mxu0 %vm1175_vm2, %v1163_v21 }
 0x411   : > { %v4416_v22 = vpop.f32.mrf.mxu0 }
 0x412   : > { %v1260_v23 = vadd.f32 %v4416_v22, %v4176_v19 }
 0x413   : > { %v1254_v24 = vpop.f32.mrf.mxu0 }
 0x414   : > { %1275 = vst.msk [vmem:[#allocation3 + $0x8] sm:$0xff] %vm1273_vm3, %v1260_v23  ;;  %v1255_v25 = vadd.f32 %v4176_v19, %v1254_v24 }
 0x415   : > { %v4419_v34 = vpop.f32.mrf.mxu0 }
 0x416   : > { %1274 = vst.msk [vmem:[#allocation3] sm:$0xff] %vm1273_vm3, %v1255_v25  ;;  %v1270_v35 = vadd.f32 %v4419_v34, %v4176_v19 }
 0x417   : > { %v1264_v36 = vpop.f32.mrf.mxu0 }
 0x418   : > { %1277 = vst.msk [vmem:[#allocation3 + $0x18] sm:$0xff] %vm1273_vm3, %v1270_v35  ;;  %v1265_v37 = vadd.f32 %v4176_v19, %v1264_v36 }
 0x41a   : > { %1276 = vst.msk [vmem:[#allocation3 + $0x10] sm:$0xff] %vm1273_vm3, %v1265_v37 }
 0x41b   : > { %v5048_v26 = vld [vmem:[#allocation3 + $0x8] sm:$0xff] }
 0x41c   : > { %1496 = vrot.lane.b32.xlu0 %v5048_v26, %s4746_s25  ;;  %v5064_v29 = vmul.f32 0.35355338, %v5048_v26 }
 0x41d   : > { %v5052_v27 = vld [vmem:[#allocation3] sm:$0xff] }
 0x41e   : > { %v5055_v28 = vmul.f32 0.35355338, %v5052_v27 }
 0x420   : > { %1494 = vrot.lane.b32.xlu0 %v5052_v27, %s4746_s25  ;;  %1490 = vrot.lane.b32.xlu1 %v5055_v28, %s4747_s24 }
 0x421   : > { %4424 = vmatprep.mubr.msk.f32.mxu1 %vm1294_vm4, %v5055_v28  ;;  %v5145_v35 = vld [vmem:[#allocation3 + $0x10] sm:$0xff] }
 0x424   : > { %1492 = vrot.lane.b32.xlu1 %v5064_v29, %s4747_s24 }
 0x48e   : > { %v1497_v30 = vpop.permute.xlu0 %1496 }
 0x48f   : > { %4434 = vmatprep.subr.msk.mxu0 %vm1294_vm4, %v1497_v30 }
 0x490   : > { %4435 = vmatpush3.xpose.msk.msra.mxu0 %vm1294_vm4, %v1497_v30 }
 0x492   : > { %v1495_v31 = vpop.permute.xlu0 %1494  ;;  %v1491_v32 = vpop.permute.xlu1 %1490 }
 0x493   : > { %4436 = vmatprep.subr.msk.mxu0 %vm1294_vm4, %v1495_v31  ;;  %4438 = vmatprep.mubr.msk.f32.mxu0 %vm1294_vm4, %v1491_v32 }
 0x494   : > { %4437 = vmatpush3.xpose.msk.msra.mxu0 %vm1294_vm4, %v1495_v31 }
 0x496   : > { %v1493_v33 = vpop.permute.xlu1 %1492 }
 0x497   : > { %4439 = vmatmul.mubr.msk.f32.vlgmr.msra.gmra.mxu0 %vm1294_vm4, %v1493_v33 }
 0x557   : > { %v4440_v39 = vpop.f32.mrf.mxu0 }
 0x558   : > { %v1578_v41 = vadd.f32 %v4440_v39, %v5076_v38  ;;  %v5149_v39 = vmul.f32 0.35355338, %v5145_v35 }
 0x559   : > { %v1572_v42 = vpop.f32.mrf.mxu0 }
 0x55a   : > { %v1573_v43 = vadd.f32 %v1572_v42, %v5078_v40  ;;  %v1584_v44 = vsel %vm1380_vm5, %v1578_v41, -inf }
 0x55b   : > { %1585 = vmax.xlane.f32.xlu1 %v1584_v44 }
 0x55c   : > { %v1581_v45 = vsel %vm1380_vm5, %v1573_v43, -inf }
 0x55d   : > { %1582 = vmax.xlane.f32.xlu0 %v1581_v45 }
 0x56c   : > { %1292 = vrot.lane.b32.xlu1 %v5048_v26, %s4748_s26 }
 0x570   : > { %1603 = vrot.lane.b32.xlu1 %v5052_v27, %s4749_s27 }
 0x574   : > { %1290 = vrot.lane.b32.xlu1 %v5052_v27, %s4748_s26 }
 0x578   : > { %1856 = vrot.lane.b32.xlu1 %v5052_v27, %s4750_s29 }
 0x57c   : > { %1854 = vrot.lane.b32.xlu1 %v5064_v29, %s4751_s2 }
 0x5e4   : > { %v1586_v46 = vpop.xlane.xlu1 %1585 }
 0x5e5   : > { %v1588_v47 = vsub.f32 %v1578_v41, %v1586_v46 }
 0x5e6   : > { %v1583_v48 = vpop.xlane.xlu0 %1582 }
 0x5e7   : > { %v1591_v49 = vmul.f32 1.442695, %v1588_v47  ;;  %v1587_v50 = vsub.f32 %v1573_v43, %v1583_v48 }
 0x5e8   : > { %v1293_v51 = vpop.permute.xlu1 %1292 }
 0x5e9   : > { %4646 = vpow2.f32 %v1591_v49  ;;  %v1589_v52 = vmul.f32 1.442695, %v1587_v50  ;;  %4420 = vmatprep.subr.msk.mxu1 %vm1294_vm4, %v1293_v51 }
 0x5ea   : > { %4421 = vmatpush3.xpose.msk.msra.mxu1 %vm1294_vm4, %v1293_v51 }
 0x5eb   : > { %4648 = vpow2.f32 %v1589_v52  ;;  %v5165_v52 = vld [vmem:[%s5518_s22] sm:$0xff] }
 0x5ec   : > { %v1604_v53 = vpop.permute.xlu1 %1603 }
 0x5f0   : > { %v1291_v54 = vpop.permute.xlu1 %1290 }
 0x5f1   : > { %4422 = vmatprep.subr.msk.mxu1 %vm1294_vm4, %v1291_v54 }
 0x5f2   : > { %4423 = vmatpush3.xpose.msk.msra.mxu1 %vm1294_vm4, %v1291_v54 }
 0x5f4   : > { %v1857_v10 = vpop.permute.xlu1 %1856 }
 0x5f5   : > { %4425 = vmatmul.mubr.msk.f32.vlgmr.msra.gmra.mxu1 %vm1294_vm4, %v5064_v29 }
 0x5f6   : > { %v4647_v55 = vpop.eup %4646 }
 0x5f7   : > { %v1596_v56 = vsel %vm1380_vm5, %v4647_v55, 0.0 }
 0x5f8   : > { %v4649_v57 = vpop.eup %4648  ;;  %1597 = vadd.xlane.f32.xlu0 %v1596_v56  ;;  %v1855_v11 = vpop.permute.xlu1 %1854 }
 0x5f9   : > { %v1593_v58 = vsel %vm1380_vm5, %v4649_v57, 0.0 }
 0x5fc   : > { %1594 = vadd.xlane.f32.xlu0 %v1593_v58 }
 0x612   : > { %1605 = vrot.lane.b32.xlu0 %v5048_v26, %s4749_s27 }
 0x616   : > { %1858 = vrot.lane.b32.xlu0 %v5048_v26, %s4750_s29 }
 0x61a   : > { %1852 = vrot.lane.b32.xlu0 %v5055_v28, %s4751_s2 }
 0x681   : > { %v1598_v59 = vpop.xlane.xlu0 %1597 }
 0x682   : > { %4650 = vrcp.f32 %v1598_v59 }
 0x685   : > { %v1595_v60 = vpop.xlane.xlu0 %1594 }
 0x686   : > { %4652 = vrcp.f32 %v1595_v60 }
 0x689   : > { %v1606_v61 = vpop.permute.xlu0 %1605 }
 0x68a   : > { %4441 = vmatprep.subr.mxu0 %v1606_v61 }
 0x68b   : > { %4442 = vmatpush3.msra.mxu0 %v1606_v61 }
 0x68c   : > { %4443 = vmatprep.subr.mxu0 %v1604_v53 }
 0x68d   : > { %4444 = vmatpush3.msra.mxu0 %v1604_v53  ;;  %v1859_v3 = vpop.permute.xlu0 %1858  ;;  %v5171_v53 = vld [vmem:[#allocation3 + $0x18] sm:$0xff] }
 0x68e   : > { %4448 = vmatprep.subr.mxu0 %v5109_v62 }
 0x68f   : > { %v4651_v63 = vpop.eup %4650 }
 0x690   : > { %v1602_v2 = vmul.f32 %v4651_v63, %v4647_v55 }
 0x691   : > { %v1853_v12 = vpop.permute.xlu0 %1852 }
 0x693   : > { %v4653_v0 = vpop.eup %4652 }
 0x694   : > { %v1601_v1 = vmul.f32 %v4653_v0, %v4649_v57 }
 0x696   : > { %4445 = vmatprep.mubr.msk.f32.mxu0 %vm1380_vm5, %v1601_v1 }
 0x697   : > { %4446 = vmatmul.mubr.msk.f32.vlgmr.msra.gmra.mxu0 %vm1380_vm5, %v1602_v2 }
 0x698   : > { %4449 = vmatpush3.msra.mxu0 %v5109_v62 }
 0x699   : > { %4458 = vmatprep.subr.msk.mxu0 %vm1294_vm4, %v1859_v3 }
 0x6b5   : > { %v4426_v4 = vpop.f32.mrf.mxu1 }
 0x6b6   : > { %v1377_v5 = vadd.f32 %v4426_v4, %v5076_v38  ;;  %v5186_v4 = vmul.f32 0.35355338, %v5171_v53 }
 0x6b7   : > { %v1371_v6 = vpop.f32.mrf.mxu1 }
 0x6b8   : > { %v1372_v7 = vadd.f32 %v1371_v6, %v5078_v40  ;;  %v1384_v8 = vsel %vm1380_vm5, %v1377_v5, -inf }
 0x6b9   : > { %1385 = vmax.xlane.f32.xlu1 %v1384_v8 }
 0x6ba   : > { %v1381_v9 = vsel %vm1380_vm5, %v1372_v7, -inf }
 0x6bb   : > { %1382 = vmax.xlane.f32.xlu0 %v1381_v9 }
 0x6ca   : > { %1405 = vrot.lane.b32.xlu1 %v5048_v26, %s4752_s21 }
 0x6ce   : > { %2141 = vrot.lane.b32.xlu1 %v5048_v26, %s4753_s5 }
 0x6d2   : > { %2139 = vrot.lane.b32.xlu1 %v5052_v27, %s4753_s5 }
 0x6d6   : > { %2137 = vrot.lane.b32.xlu1 %v5064_v29, %s4754_s23 }
 0x742   : > { %v1386_v13 = vpop.xlane.xlu1 %1385 }
 0x743   : > { %v1388_v14 = vsub.f32 %v1377_v5, %v1386_v13 }
 0x744   : > { %v1383_v16 = vpop.xlane.xlu0 %1382 }
 0x745   : > { %v1391_v17 = vmul.f32 1.442695, %v1388_v14  ;;  %v1387_v18 = vsub.f32 %v1372_v7, %v1383_v16 }
 0x746   : > { %v1406_v19 = vpop.permute.xlu1 %1405 }
 0x747   : > { %4654 = vpow2.f32 %v1391_v17  ;;  %v1389_v20 = vmul.f32 1.442695, %v1387_v18  ;;  %4427 = vmatprep.subr.mxu1 %v1406_v19 }
 0x748   : > { %4428 = vmatpush3.msra.mxu1 %v1406_v19 }
 0x749   : > { %4656 = vpow2.f32 %v1389_v20  ;;  %v5203_v20 = vld [vmem:[%s5518_s22 + $0x10] sm:$0xff] }
 0x74a   : > { %v2142_v30 = vpop.permute.xlu1 %2141 }
 0x74e   : > { %v2140_v31 = vpop.permute.xlu1 %2139 }
 0x752   : > { %v2138_v37 = vpop.permute.xlu1 %2137 }
 0x754   : > { %v4655_v21 = vpop.eup %4654 }
 0x755   : > { %v1396_v22 = vsel %vm1380_vm5, %v4655_v21, 0.0 }
 0x756   : > { %v4657_v23 = vpop.eup %4656  ;;  %1397 = vadd.xlane.f32.xlu0 %v1396_v22 }
 0x757   : > { %v4447_v24 = vpop.f32.mrf.mxu0  ;;  %v1393_v29 = vsel %vm1380_vm5, %v4657_v23, 0.0 }
 0x759   : > { %v1681_v25 = vpop.f32.mrf.mxu0 }
 0x75a   : > { %4450 = vmatprep.mubr.msk.f32.mxu0 %vm1294_vm4, %v1681_v25  ;;  %1394 = vadd.xlane.f32.xlu0 %v1393_v29  ;;  %v5209_v29 = vld [vmem:[#allocation5 + $0x10] sm:$0xff] }
 0x75b   : > { %4451 = vmatmul.mubr.msk.f32.vlgmr.msra.gmra.mxu0 %vm1294_vm4, %v4447_v24 }
 0x75c   : > { %4459 = vmatpush3.xpose.msk.msra.mxu0 %vm1294_vm4, %v1859_v3  ;;  %4462 = vmatprep.mubr.msk.f32.mxu0 %vm1294_vm4, %v1853_v12 }
 0x75d   : > { %4460 = vmatprep.subr.msk.mxu0 %vm1294_vm4, %v1857_v10 }
 0x760   : > { %4461 = vmatpush3.xpose.msk.msra.mxu0 %vm1294_vm4, %v1857_v10 }
 0x761   : > { %4477 = vmatprep.subr.msk.mxu0 %vm1294_vm4, %v2142_v30 }
 0x763   : > { %4463 = vmatmul.mubr.msk.f32.vlgmr.msra.gmra.mxu0 %vm1294_vm4, %v1855_v11 }
 0x764   : > { %4478 = vmatpush3.xpose.msk.msra.mxu0 %vm1294_vm4, %v2142_v30 }
 0x765   : > { %4479 = vmatprep.subr.msk.mxu0 %vm1294_vm4, %v2140_v31 }
 0x768   : > { %4480 = vmatpush3.xpose.msk.msra.mxu0 %vm1294_vm4, %v2140_v31 }
 0x770   : > { %1403 = vrot.lane.b32.xlu0 %v5052_v27, %s4752_s21 }
 0x774   : > { %2135 = vrot.lane.b32.xlu0 %v5055_v28, %s4754_s23 }
 0x7df   : > { %v1398_v32 = vpop.xlane.xlu0 %1397 }
 0x7e0   : > { %4658 = vrcp.f32 %v1398_v32 }
 0x7e3   : > { %v1395_v33 = vpop.xlane.xlu0 %1394 }
 0x7e4   : > { %4660 = vrcp.f32 %v1395_v33 }
 0x7e7   : > { %v1404_v34 = vpop.permute.xlu0 %1403 }
 0x7e8   : > { %4429 = vmatprep.subr.mxu1 %v1404_v34 }
 0x7e9   : > { %4430 = vmatpush3.msra.mxu1 %v1404_v34 }
 0x7ea   : > { %4453 = vmatprep.subr.mxu1 %v5165_v52 }
 0x7eb   : > { %v2136_v36 = vpop.permute.xlu0 %2135 }
 0x7ec   : > { %4481 = vmatprep.mubr.msk.f32.mxu0 %vm1294_vm4, %v2136_v36 }
 0x7ed   : > { %4482 = vmatmul.mubr.msk.f32.vlgmr.msra.gmra.mxu0 %vm1294_vm4, %v2138_v37  ;;  %v4659_v28 = vpop.eup %4658 }
 0x7ee   : > { %4500 = vmatprep.mubr.msk.f32.mxu0 %vm1294_vm4, %v5149_v39  ;;  %v1402_v43 = vmul.f32 %v4659_v28, %v4655_v21 }
 0x7f1   : > { %v4661_v41 = vpop.eup %4660 }
 0x7f2   : > { %v1401_v42 = vmul.f32 %v4661_v41, %v4657_v23  ;;  %v5222_v41 = vld [vmem:[#allocation5 + $0x18] sm:$0xff] }
 0x7f4   : > { %4431 = vmatprep.mubr.msk.f32.mxu1 %vm1380_vm5, %v1401_v42 }
 0x7f5   : > { %4432 = vmatmul.mubr.msk.f32.vlgmr.msra.gmra.mxu1 %vm1380_vm5, %v1402_v43 }
 0x7f6   : > { %4454 = vmatpush3.msra.mxu1 %v5165_v52 }
 0x81b   : > { %v5156_v44 = vpop.f32.mrf.mxu0 }
 0x81d   : > { %v5158_v45 = vpop.f32.mrf.mxu0 }
 0x823   : > { %v4464_v46 = vpop.f32.mrf.mxu0 }
 0x824   : > { %v1940_v47 = vadd.f32 %v4464_v46, %v5076_v38 }
 0x825   : > { %v1934_v48 = vpop.f32.mrf.mxu0 }
 0x826   : > { %v1935_v49 = vadd.f32 %v1934_v48, %v5078_v40  ;;  %v1946_v50 = vsel %vm1380_vm5, %v1940_v47, -inf }
 0x827   : > { %1947 = vmax.xlane.f32.xlu1 %v1946_v50 }
 0x828   : > { %v1943_v51 = vsel %vm1380_vm5, %v1935_v49, -inf }
 0x829   : > { %1944 = vmax.xlane.f32.xlu0 %v1943_v51 }
 0x838   : > { %1967 = vrot.lane.b32.xlu1 %v5048_v26, %s4755_s1 }
 0x83c   : > { %2439 = vrot.lane.b32.xlu1 %v5171_v53, %s4748_s26 }
 0x840   : > { %2437 = vrot.lane.b32.xlu1 %v5145_v35, %s4748_s26  ;;  %s4756_s26 = smov 40  }
 0x8ad   : > { %v4483_v54 = vpop.f32.mrf.mxu0 }
 0x8ae   : > { %v2223_v55 = vadd.f32 %v4483_v54, %v5076_v38 }
 0x8af   : > { %v2217_v9 = vpop.f32.mrf.mxu0 }
 0x8b0   : > { %v1948_v56 = vpop.xlane.xlu1 %1947  ;;  %v2229_v57 = vsel %vm1380_vm5, %v2223_v55, -inf  ;;  %v2218_v10 = vadd.f32 %v2217_v9, %v5078_v40 }
 0x8b1   : > { %v1950_v58 = vsub.f32 %v1940_v47, %v1948_v56  ;;  %2230 = vmax.xlane.f32.xlu1 %v2229_v57 }
 0x8b2   : > { %v1945_v59 = vpop.xlane.xlu0 %1944  ;;  %v2226_v11 = vsel %vm1380_vm5, %v2218_v10, -inf }
 0x8b3   : > { %v1953_v60 = vmul.f32 1.442695, %v1950_v58  ;;  %v1949_v61 = vsub.f32 %v1935_v49, %v1945_v59  ;;  %v5232_v59 = vld [vmem:[%s5518_s22 + $0x18] sm:$0xff]  ;;  %s5519_s22 = scalar_lea.vmem %s5481_s10, %s4869_s20 }
 0x8b4   : > { %v1968_v63 = vpop.permute.xlu1 %1967 }
 0x8b5   : > { %4662 = vpow2.f32 %v1953_v60  ;;  %v1951_v0 = vmul.f32 1.442695, %v1949_v61  ;;  %4465 = vmatprep.subr.mxu1 %v1968_v63  ;;  %v4433_v1 = vpop.f32.mrf.mxu1 }
 0x8b7   : > { %4664 = vpow2.f32 %v1951_v0  ;;  %v1481_v2 = vpop.f32.mrf.mxu1 }
 0x8b8   : > { %v2440_v3 = vpop.permute.xlu1 %2439  ;;  %4455 = vmatprep.mubr.msk.f32.mxu1 %vm1294_vm4, %v1481_v2 }
 0x8b9   : > { %4496 = vmatprep.subr.msk.mxu0 %vm1294_vm4, %v2440_v3  ;;  %4456 = vmatmul.mubr.msk.f32.vlgmr.msra.gmra.mxu1 %vm1294_vm4, %v4433_v1 }
 0x8ba   : > { %4466 = vmatpush3.msra.mxu1 %v1968_v63  ;;  %4497 = vmatpush3.xpose.msk.msra.mxu0 %vm1294_vm4, %v2440_v3 }
 0x8bc   : > { %v2438_v38 = vpop.permute.xlu1 %2437 }
 0x8bd   : > { %4498 = vmatprep.subr.msk.mxu0 %vm1294_vm4, %v2438_v38 }
 0x8be   : > { %4499 = vmatpush3.xpose.msk.msra.mxu0 %vm1294_vm4, %v2438_v38 }
 0x8c1   : > { %4501 = vmatmul.mubr.msk.f32.vlgmr.msra.gmra.mxu0 %vm1294_vm4, %v5186_v4 }
 0x8c2   : > { %v4663_v5 = vpop.eup %4662  ;;  %2250 = vrot.lane.b32.xlu1 %v5048_v26, %s4756_s26 }
 0x8c3   : > { %v1958_v6 = vsel %vm1380_vm5, %v4663_v5, 0.0 }
 0x8c4   : > { %v4665_v7 = vpop.eup %4664  ;;  %1959 = vadd.xlane.f32.xlu0 %v1958_v6 }
 0x8c5   : > { %v1955_v8 = vsel %vm1380_vm5, %v4665_v7, 0.0 }
 0x8c8   : > { %1956 = vadd.xlane.f32.xlu0 %v1955_v8 }
 0x8de   : > { %1965 = vrot.lane.b32.xlu0 %v5052_v27, %s4755_s1 }
 0x8fd   : > { %2227 = vmax.xlane.f32.xlu0 %v2226_v11 }
 0x93a   : > { %v2231_v12 = vpop.xlane.xlu1 %2230 }
 0x93b   : > { %v2233_v13 = vsub.f32 %v2223_v55, %v2231_v12 }
 0x93d   : > { %v2236_v26 = vmul.f32 1.442695, %v2233_v13 }
 0x93e   : > { %v2251_v24 = vpop.permute.xlu1 %2250 }
 0x93f   : > { %4666 = vpow2.f32 %v2236_v26 }
 0x94c   : > { %v5198_v14 = vpop.eup %4666 }
 0x94d   : > { %v1960_v16 = vpop.xlane.xlu0 %1959  ;;  %v2241_v17 = vsel %vm1380_vm5, %v5198_v14, 0.0 }
 0x94e   : > { %2242 = vadd.xlane.f32.xlu0 %v2241_v17  ;;  %4668 = vrcp.f32 %v1960_v16 }
 0x951   : > { %v1957_v18 = vpop.xlane.xlu0 %1956 }
 0x952   : > { %4670 = vrcp.f32 %v1957_v18 }
 0x955   : > { %v1966_v19 = vpop.permute.xlu0 %1965 }
 0x956   : > { %4467 = vmatprep.subr.mxu1 %v1966_v19 }
 0x957   : > { %4468 = vmatpush3.msra.mxu1 %v1966_v19 }
 0x958   : > { %4472 = vmatprep.subr.mxu1 %v5203_v20 }
 0x95b   : > { %v4669_v40 = vpop.eup %4668 }
 0x95c   : > { %v1964_v23 = vmul.f32 %v4669_v40, %v4663_v5 }
 0x95f   : > { %v4671_v21 = vpop.eup %4670 }
 0x960   : > { %v1963_v22 = vmul.f32 %v4671_v21, %v4665_v7 }
 0x962   : > { %4469 = vmatprep.mubr.msk.f32.mxu1 %vm1380_vm5, %v1963_v22 }
 0x963   : > { %4470 = vmatmul.mubr.msk.f32.vlgmr.msra.gmra.mxu1 %vm1380_vm5, %v1964_v23 }
 0x964   : > { %4473 = vmatpush3.msra.mxu1 %v5203_v20 }
 0x965   : > { %4484 = vmatprep.subr.mxu1 %v2251_v24 }
 0x979   : > { %v4457_v49 = vpop.f32.mrf.mxu1 }
 0x97b   : > { %v5226_v51 = vpop.f32.mrf.mxu1 }
 0x97c   : > { %v1844_v23 = vadd.f32 %v5226_v51, %v5158_v45 }
 0x981   : > { %v4502_v25 = vpop.f32.mrf.mxu0 }
 0x982   : > { %v2523_v42 = vadd.f32 %v4502_v25, %v5222_v41  ;;  %v5266_v25 = vld [vmem:[%s5519_s22] ss:$0 sm:$0xff]  ;;  %s5523_s22 = scalar_lea.vmem %s5488_s17, %s4869_s20 }
 0x983   : > { %v2517_v30 = vpop.f32.mrf.mxu0 }
 0x984   : > { %v2518_v31 = vadd.f32 %v2517_v30, %v5209_v29  ;;  %v2529_v43 = vsel %vm1380_vm5, %v2523_v42, -inf }
 0x986   : > { %v2228_v32 = vpop.xlane.xlu0 %2227  ;;  %v2526_v33 = vsel %vm1380_vm5, %v2518_v31, -inf }
 0x987   : > { %v2232_v34 = vsub.f32 %v2218_v10, %v2228_v32  ;;  %2527 = vmax.xlane.f32.xlu1 %v2526_v33  ;;  %v1849_v10 = vadd.f32 %v4457_v49, %v5156_v44 }
 0x989   : > { %v2234_v36 = vmul.f32 1.442695, %v2232_v34 }
 0x98b   : > { %4672 = vpow2.f32 %v2234_v36 }
 0x998   : > { %v4673_v37 = vpop.eup %4672  ;;  %2550 = vrot.lane.b32.xlu1 %v5171_v53, %s4752_s21 }
 0x999   : > { %v2238_v28 = vsel %vm1380_vm5, %v4673_v37, 0.0 }
 0x99a   : > { %2239 = vadd.xlane.f32.xlu0 %v2238_v28 }
 0x99c   : > { %2641 = vrot.lane.b32.xlu1 %v5171_v53, %s4746_s25 }
 0x9a0   : > { %2639 = vrot.lane.b32.xlu1 %v5145_v35, %s4746_s25 }
 0x9b0   : > { %2248 = vrot.lane.b32.xlu0 %v5052_v27, %s4756_s26 }
 0x9cf   : > { %2530 = vmax.xlane.f32.xlu0 %v2529_v43 }
 0x9d7   : > { %v2243_v50 = vpop.xlane.xlu0 %2242 }
 0xa10   : > { %v2528_v46 = vpop.xlane.xlu1 %2527 }
 0xa11   : > { %v2532_v47 = vsub.f32 %v2518_v31, %v2528_v46 }
 0xa13   : > { %v2534_v48 = vmul.f32 1.442695, %v2532_v47 }
 0xa14   : > { %v2551_v1 = vpop.permute.xlu1 %2550 }
 0xa15   : > { %4674 = vpow2.f32 %v2534_v48 }
 0xa16   : > { %4676 = vrcp.f32 %v2243_v50 }
 0xa18   : > { %v2642_v7 = vpop.permute.xlu1 %2641 }
 0xa1c   : > { %v2640_v8 = vpop.permute.xlu1 %2639 }
 0xa22   : > { %v4675_v54 = vpop.eup %4674 }
 0xa23   : > { %v4471_v55 = vpop.f32.mrf.mxu1  ;;  %v2240_v27 = vpop.xlane.xlu0 %2239  ;;  %v2538_v56 = vsel %vm1380_vm5, %v4675_v54, 0.0 }
 0xa24   : > { %4678 = vrcp.f32 %v2240_v27  ;;  %2539 = vadd.xlane.f32.xlu1 %v2538_v56  ;;  %v4677_v60 = vpop.eup %4676 }
 0xa25   : > { %v2043_v57 = vpop.f32.mrf.mxu1  ;;  %v2247_v0 = vmul.f32 %v4677_v60, %v5198_v14 }
 0xa26   : > { %4474 = vmatprep.mubr.msk.f32.mxu1 %vm1294_vm4, %v2043_v57 }
 0xa27   : > { %4475 = vmatmul.mubr.msk.f32.vlgmr.msra.gmra.mxu1 %vm1294_vm4, %v4471_v55  ;;  %v2249_v58 = vpop.permute.xlu0 %2248 }
 0xa28   : > { %4485 = vmatpush3.msra.mxu1 %v2251_v24 }
 0xa29   : > { %4486 = vmatprep.subr.mxu1 %v2249_v58 }
 0xa2a   : > { %4487 = vmatpush3.msra.mxu1 %v2249_v58 }
 0xa2b   : > { %4491 = vmatprep.subr.mxu1 %v5232_v59 }
 0xa31   : > { %v4679_v61 = vpop.eup %4678 }
 0xa32   : > { %v2246_v63 = vmul.f32 %v4679_v61, %v4673_v37 }
 0xa34   : > { %4488 = vmatprep.mubr.msk.f32.mxu1 %vm1380_vm5, %v2246_v63 }
 0xa35   : > { %2637 = vrot.lane.b32.xlu1 %v5186_v4, %s4747_s24  ;;  %4489 = vmatmul.mubr.msk.f32.vlgmr.msra.gmra.mxu1 %vm1380_vm5, %v2247_v0 }
 0xa36   : > { %4492 = vmatpush3.msra.mxu1 %v5232_v59 }
 0xa37   : > { %4503 = vmatprep.subr.mxu1 %v2551_v1 }
 0xa58   : > { %v2531_v2 = vpop.xlane.xlu0 %2530 }
 0xa59   : > { %v2533_v3 = vsub.f32 %v2523_v42, %v2531_v2 }
 0xa5b   : > { %v2536_v38 = vmul.f32 1.442695, %v2533_v3 }
 0xa5d   : > { %4680 = vpow2.f32 %v2536_v38 }
 0xa6a   : > { %v4681_v5 = vpop.eup %4680 }
 0xa6b   : > { %v2541_v6 = vsel %vm1380_vm5, %v4681_v5, 0.0 }
 0xa6c   : > { %2542 = vadd.xlane.f32.xlu0 %v2541_v6 }
 0xa82   : > { %2548 = vrot.lane.b32.xlu0 %v5145_v35, %s4752_s21 }
 0xa86   : > { %2635 = vrot.lane.b32.xlu0 %v5149_v39, %s4747_s24 }
 0xaad   : > { %v2540_v9 = vpop.xlane.xlu1 %2539 }
 0xaae   : > { %4682 = vrcp.f32 %v2540_v9 }
 0xab1   : > { %v2638_v22 = vpop.permute.xlu1 %2637 }
 0xabb   : > { %v4683_v26 = vpop.eup %4682 }
 0xabc   : > { %v2546_v18 = vmul.f32 %v4683_v26, %v4675_v54 }
 0xae7   : > { %v4476_v11 = vpop.f32.mrf.mxu1 }
 0xae8   : > { %v2134_v12 = vadd.f32 %v4476_v11, %v1849_v10 }
 0xae9   : > { %v2124_v13 = vpop.f32.mrf.mxu1 }
 0xaea   : > { %v2133_v30 = vadd.f32 %v2124_v13, %v1844_v23 }
 0xaf5   : > { %v4490_v14 = vpop.f32.mrf.mxu1  ;;  %v2543_v16 = vpop.xlane.xlu0 %2542 }
 0xaf6   : > { %4684 = vrcp.f32 %v2543_v16 }
 0xaf7   : > { %v2326_v17 = vpop.f32.mrf.mxu1 }
 0xaf8   : > { %4493 = vmatprep.mubr.msk.f32.mxu1 %vm1294_vm4, %v2326_v17 }
 0xaf9   : > { %4494 = vmatmul.mubr.msk.f32.vlgmr.msra.gmra.mxu1 %vm1294_vm4, %v4490_v14  ;;  %v2549_v19 = vpop.permute.xlu0 %2548 }
 0xafa   : > { %4504 = vmatpush3.msra.mxu1 %v2551_v1  ;;  %4507 = vmatprep.mubr.msk.f32.mxu1 %vm1380_vm5, %v2546_v18 }
 0xafb   : > { %4505 = vmatprep.subr.mxu1 %v2549_v19 }
 0xafc   : > { %4506 = vmatpush3.msra.mxu1 %v2549_v19 }
 0xafd   : > { %4510 = vmatprep.subr.msk.mxu1 %vm1294_vm4, %v2642_v7  ;;  %v2636_v21 = vpop.permute.xlu0 %2635 }
 0xb03   : > { %v4685_v44 = vpop.eup %4684 }
 0xb04   : > { %v2547_v40 = vmul.f32 %v4685_v44, %v4681_v5 }
 0xb06   : > { %4508 = vmatmul.mubr.msk.f32.vlgmr.msra.gmra.mxu1 %vm1380_vm5, %v2547_v40 }
 0xb07   : > { %4511 = vmatpush3.xpose.msk.msra.mxu1 %vm1294_vm4, %v2642_v7  ;;  %4514 = vmatprep.mubr.msk.f32.mxu1 %vm1294_vm4, %v2636_v21 }
 0xb08   : > { %4512 = vmatprep.subr.msk.mxu1 %vm1294_vm4, %v2640_v8 }
 0xb0b   : > { %4513 = vmatpush3.xpose.msk.msra.mxu1 %vm1294_vm4, %v2640_v8 }
 0xb0c   : > { %4529 = vmatprep.subr.mxu1 %v5165_v52 }
 0xb0e   : > { %4515 = vmatmul.mubr.msk.f32.vlgmr.msra.gmra.mxu1 %vm1294_vm4, %v2638_v22 }
 0xb0f   : > { %4530 = vmatpush3.msra.mxu1 %v5165_v52 }
 0xbb9   : > { %v4495_v24 = vpop.f32.mrf.mxu1 }
 0xbba   : > { %v2417_v31 = vadd.f32 %v4495_v24, %v2134_v12 }
 0xbbb   : > { %v2407_v32 = vpop.f32.mrf.mxu1 }
 0xbbc   : > { %v2426_v33 = vadd.f32 %v5266_v25, %v2417_v31  ;;  %v2416_v34 = vadd.f32 %v2407_v32, %v2133_v30 }
 0xbbe   : > { %2428 = vst.msk [vmem:[#allocation4 + $0x8] sm:$0xff] %vm1175_vm2, %v2426_v33  ;;  %v2425_v52 = vadd.f32 %v5266_v25, %v2416_v34 }
 0xbc0   : > { %2427 = vst.msk [vmem:[#allocation4] sm:$0xff] %vm1175_vm2, %v2425_v52 }
 0xbc6   : > { %v4509_v45 = vpop.f32.mrf.mxu1 }
 0xbc8   : > { %v2626_v36 = vpop.f32.mrf.mxu1 }
 0xbc9   : > { %4531 = vmatprep.mubr.msk.f32.mxu1 %vm1294_vm4, %v2626_v36 }
 0xbca   : > { %4532 = vmatmul.mubr.msk.f32.vlgmr.msra.gmra.mxu1 %vm1294_vm4, %v4509_v45 }
 0xbce   : > { %v4516_v37 = vpop.f32.mrf.mxu1 }
 0xbcf   : > { %v2723_v28 = vadd.f32 %v4516_v37, %v5222_v41 }
 0xbd0   : > { %v2717_v42 = vpop.f32.mrf.mxu1 }
 0xbd1   : > { %v2718_v43 = vadd.f32 %v2717_v42, %v5209_v29  ;;  %v2729_v46 = vsel %vm1380_vm5, %v2723_v28, -inf }
 0xbd2   : > { %2730 = vmax.xlane.f32.xlu1 %v2729_v46 }
 0xbd3   : > { %v2726_v47 = vsel %vm1380_vm5, %v2718_v43, -inf }
 0xbd4   : > { %2727 = vmax.xlane.f32.xlu0 %v2726_v47 }
 0xbe3   : > { %2750 = vrot.lane.b32.xlu1 %v5171_v53, %s4749_s27 }
 0xbe7   : > { %3003 = vrot.lane.b32.xlu1 %v5171_v53, %s4750_s29 }
 0xbeb   : > { %3001 = vrot.lane.b32.xlu1 %v5145_v35, %s4750_s29  ;;  %s5521_s29 = scalar_lea.vmem %s5483_s12, %s4869_s20 }
 0xbef   : > { %2999 = vrot.lane.b32.xlu1 %v5186_v4, %s4751_s2 }
 0xbf3   : > { %3284 = vrot.lane.b32.xlu1 %v5145_v35, %s4753_s5 }
 0xbf7   : > { %3282 = vrot.lane.b32.xlu1 %v5186_v4, %s4754_s23 }
 0xc5b   : > { %v2731_v48 = vpop.xlane.xlu1 %2730 }
 0xc5c   : > { %v2733_v49 = vsub.f32 %v2723_v28, %v2731_v48 }
 0xc5d   : > { %v2728_v50 = vpop.xlane.xlu0 %2727 }
 0xc5e   : > { %v2736_v51 = vmul.f32 1.442695, %v2733_v49  ;;  %v2732_v54 = vsub.f32 %v2718_v43, %v2728_v50  ;;  %v3574_v49 = vld [vmem:[#allocation4] sm:$0xff] }
 0xc5f   : > { %v2751_v55 = vpop.permute.xlu1 %2750  ;;  %v5340_v50 = vadd.f32 %v3574_v49, %v5032_v15  ;;  %v3659_v49 = vld [vmem:[%s4901_s7 + $0x10] sm:$0xff] }
 0xc60   : > { %4686 = vpow2.f32 %v2736_v51  ;;  %v2734_v27 = vmul.f32 1.442695, %v2732_v54  ;;  %4517 = vmatprep.subr.mxu0 %v2751_v55 }
 0xc61   : > { %4518 = vmatpush3.msra.mxu0 %v2751_v55  ;;  %v3584_v51 = vsel %vm1175_vm2, %v5340_v50, 0.0 }
 0xc62   : > { %4688 = vpow2.f32 %v2734_v27 }
 0xc63   : > { %v3004_v38 = vpop.permute.xlu1 %3003 }
 0xc67   : > { %v3002_v6 = vpop.permute.xlu1 %3001 }
 0xc6b   : > { %v3000_v9 = vpop.permute.xlu1 %2999 }
 0xc6d   : > { %v4687_v56 = vpop.eup %4686 }
 0xc6e   : > { %v2741_v57 = vsel %vm1380_vm5, %v4687_v56, 0.0 }
 0xc6f   : > { %v4689_v58 = vpop.eup %4688  ;;  %2742 = vadd.xlane.f32.xlu0 %v2741_v57  ;;  %v3285_v10 = vpop.permute.xlu1 %3284 }
 0xc70   : > { %v2738_v60 = vsel %vm1380_vm5, %v4689_v58, 0.0 }
 0xc73   : > { %2739 = vadd.xlane.f32.xlu0 %v2738_v60  ;;  %v3283_v11 = vpop.permute.xlu1 %3282 }
 0xc89   : > { %2748 = vrot.lane.b32.xlu0 %v5145_v35, %s4749_s27  ;;  %s5525_s27 = sld [smem:[#allocation16_spill]] (!%p4261_p5) }
 0xc8d   : > { %2997 = vrot.lane.b32.xlu0 %v5149_v39, %s4751_s2 }
 0xc91   : > { %3286 = vrot.lane.b32.xlu0 %v5171_v53, %s4753_s5 }
 0xc95   : > { %3280 = vrot.lane.b32.xlu0 %v5149_v39, %s4754_s23 }
 0xcf8   : > { %v2743_v4 = vpop.xlane.xlu0 %2742 }
 0xcf9   : > { %4690 = vrcp.f32 %v2743_v4 }
 0xcfc   : > { %v2740_v61 = vpop.xlane.xlu0 %2739 }
 0xcfd   : > { %4692 = vrcp.f32 %v2740_v61 }
 0xd00   : > { %v2749_v63 = vpop.permute.xlu0 %2748 }
 0xd01   : > { %4519 = vmatprep.subr.mxu0 %v2749_v63 }
 0xd02   : > { %4520 = vmatpush3.msra.mxu0 %v2749_v63 }
 0xd03   : > { %4524 = vmatprep.subr.mxu0 %v5109_v62 }
 0xd04   : > { %v2998_v39 = vpop.permute.xlu0 %2997 }
 0xd06   : > { %v4691_v0 = vpop.eup %4690 }
 0xd07   : > { %v2747_v3 = vmul.f32 %v4691_v0, %v4687_v56 }
 0xd08   : > { %v3287_v8 = vpop.permute.xlu0 %3286 }
 0xd0a   : > { %v4693_v1 = vpop.eup %4692 }
 0xd0b   : > { %v2746_v2 = vmul.f32 %v4693_v1, %v4689_v58  ;;  %v3575_v1 = vld [vmem:[#allocation4 + $0x8] sm:$0xff] }
 0xd0d   : > { %4521 = vmatprep.mubr.msk.f32.mxu0 %vm1380_vm5, %v2746_v2  ;;  %v4734_v2 = vld [vmem:[#allocation2 + $0x8] sm:$0xff] }
 0xd0e   : > { %4522 = vmatmul.mubr.msk.f32.vlgmr.msra.gmra.mxu0 %vm1380_vm5, %v2747_v3  ;;  %v3579_v3 = vadd.f32 %v4734_v2, %v3575_v1 }
 0xd0f   : > { %4525 = vmatpush3.msra.mxu0 %v5109_v62  ;;  %v3281_v62 = vpop.permute.xlu0 %3280 }
 0xd10   : > { %4534 = vmatprep.subr.msk.mxu0 %vm1294_vm4, %v3004_v38 }
 0xdce   : > { %v4523_v5 = vpop.f32.mrf.mxu0 }
 0xdd0   : > { %v2826_v7 = vpop.f32.mrf.mxu0 }
 0xdd1   : > { %4526 = vmatprep.mubr.msk.f32.mxu0 %vm1294_vm4, %v2826_v7 }
 0xdd2   : > { %4527 = vmatmul.mubr.msk.f32.vlgmr.msra.gmra.mxu0 %vm1294_vm4, %v4523_v5 }
 0xdd3   : > { %4535 = vmatpush3.xpose.msk.msra.mxu0 %vm1294_vm4, %v3004_v38  ;;  %4538 = vmatprep.mubr.msk.f32.mxu0 %vm1294_vm4, %v2998_v39  ;;  %v3587_v38 = vsel %vm1175_vm2, %v3579_v3, 0.0 }
 0xdd4   : > { %4536 = vmatprep.subr.msk.mxu0 %vm1294_vm4, %v3002_v6 }
 0xdd7   : > { %4537 = vmatpush3.xpose.msk.msra.mxu0 %vm1294_vm4, %v3002_v6 }
 0xdd8   : > { %4553 = vmatprep.subr.msk.mxu0 %vm1294_vm4, %v3287_v8 }
 0xdda   : > { %4539 = vmatmul.mubr.msk.f32.vlgmr.msra.gmra.mxu0 %vm1294_vm4, %v3000_v9 }
 0xddb   : > { %4554 = vmatpush3.xpose.msk.msra.mxu0 %vm1294_vm4, %v3287_v8  ;;  %4557 = vmatprep.mubr.msk.f32.mxu0 %vm1294_vm4, %v3281_v62 }
 0xddc   : > { %4555 = vmatprep.subr.msk.mxu0 %vm1294_vm4, %v3285_v10 }
 0xddf   : > { %4556 = vmatpush3.xpose.msk.msra.mxu0 %vm1294_vm4, %v3285_v10 }
 0xde2   : > { %4558 = vmatmul.mubr.msk.f32.vlgmr.msra.gmra.mxu0 %vm1294_vm4, %v3283_v11 }
 0xe92   : > { %v5318_v12 = vpop.f32.mrf.mxu0 }
 0xe94   : > { %v5320_v13 = vpop.f32.mrf.mxu0 }
 0xe9a   : > { %v4540_v26 = vpop.f32.mrf.mxu0 }
 0xe9b   : > { %v3085_v14 = vadd.f32 %v4540_v26, %v5222_v41 }
 0xe9c   : > { %v3079_v16 = vpop.f32.mrf.mxu0 }
 0xe9d   : > { %v3080_v17 = vadd.f32 %v3079_v16, %v5209_v29  ;;  %v3091_v18 = vsel %vm1380_vm5, %v3085_v14, -inf }
 0xe9e   : > { %3092 = vmax.xlane.f32.xlu1 %v3091_v18 }
 0xe9f   : > { %v3088_v19 = vsel %vm1380_vm5, %v3080_v17, -inf }
 0xea0   : > { %3089 = vmax.xlane.f32.xlu0 %v3088_v19 }
 0xea2   : > { %v4559_v44 = vpop.f32.mrf.mxu0 }
 0xea3   : > { %v3368_v46 = vadd.f32 %v4559_v44, %v5222_v41 }
 0xea4   : > { %v3362_v40 = vpop.f32.mrf.mxu0 }
 0xea5   : > { %v3363_v21 = vadd.f32 %v3362_v40, %v5209_v29  ;;  %v3374_v48 = vsel %vm1380_vm5, %v3368_v46, -inf }
 0xea7   : > { %v3371_v22 = vsel %vm1380_vm5, %v3363_v21, -inf }
 0xeaf   : > { %3112 = vrot.lane.b32.xlu1 %v5171_v53, %s4755_s1 }
 0xed3   : > { %3372 = vmax.xlane.f32.xlu1 %v3371_v22 }
 0xf27   : > { %v3093_v23 = vpop.xlane.xlu1 %3092 }
 0xf28   : > { %v3095_v24 = vsub.f32 %v3085_v14, %v3093_v23 }
 0xf29   : > { %v3090_v30 = vpop.xlane.xlu0 %3089 }
 0xf2a   : > { %v3098_v31 = vmul.f32 1.442695, %v3095_v24  ;;  %v3094_v32 = vsub.f32 %v3080_v17, %v3090_v30 }
 0xf2b   : > { %v3113_v33 = vpop.permute.xlu1 %3112 }
 0xf2c   : > { %4694 = vpow2.f32 %v3098_v31  ;;  %v3096_v34 = vmul.f32 1.442695, %v3094_v32  ;;  %4541 = vmatprep.subr.mxu1 %v3113_v33 }
 0xf2d   : > { %4542 = vmatpush3.msra.mxu1 %v3113_v33 }
 0xf2e   : > { %4696 = vpow2.f32 %v3096_v34 }
 0xf39   : > { %v4695_v52 = vpop.eup %4694 }
 0xf3a   : > { %v3103_v45 = vsel %vm1380_vm5, %v4695_v52, 0.0 }
 0xf3b   : > { %v4697_v36 = vpop.eup %4696  ;;  %3104 = vadd.xlane.f32.xlu0 %v3103_v45 }
 0xf3c   : > { %v3100_v29 = vsel %vm1380_vm5, %v4697_v36, 0.0 }
 0xf3f   : > { %3101 = vadd.xlane.f32.xlu0 %v3100_v29 }
 0xf55   : > { %3110 = vrot.lane.b32.xlu0 %v5145_v35, %s4755_s1  ;;  %s5520_s1 = scalar_lea.vmem %s5482_s11, %s4869_s20 }
 0xf5c   : > { %v3373_v37 = vpop.xlane.xlu1 %3372 }
 0xf5d   : > { %v3377_v28 = vsub.f32 %v3363_v21, %v3373_v37  ;;  %v4736_v37 = vld [vmem:[#allocation2 + $0x10] sm:$0xff] }
 0xf5f   : > { %v3379_v42 = vmul.f32 1.442695, %v3377_v28 }
 0xf61   : > { %4698 = vpow2.f32 %v3379_v42 }
 0xf6e   : > { %v4699_v43 = vpop.eup %4698 }
 0xf6f   : > { %v3383_v47 = vsel %vm1380_vm5, %v4699_v43, 0.0 }
 0xf70   : > { %3384 = vadd.xlane.f32.xlu1 %v3383_v47 }
 0xf74   : > { %3375 = vmax.xlane.f32.xlu0 %v3374_v48  ;;  %v3660_v48 = vld [vmem:[%s4901_s7 + $0x18] sm:$0xff] }
 0xf75   : > { %4572 = vmatprep.subr.mxu0 %v3660_v48 }
 0xf76   : > { %4573 = vmatpush3.msra.mxu0 %v3660_v48 }
 0xf77   : > { %4574 = vmatprep.subr.mxu0 %v3659_v49 }
 0xf78   : > { %4575 = vmatpush3.msra.mxu0 %v3659_v49 }
 0xf81   : > { %3395 = vrot.lane.b32.xlu1 %v5171_v53, %s4756_s26 }
 0xfa5   : > { %3585 = vadd.xlane.f32.xlu1 %v3584_v51  ;;  %v3657_v51 = vld [vmem:[%s4901_s7] sm:$0xff] }
 0xfc4   : > { %v3105_v54 = vpop.xlane.xlu0 %3104 }
 0xfc5   : > { %4700 = vrcp.f32 %v3105_v54 }
 0xfc8   : > { %v3102_v41 = vpop.xlane.xlu0 %3101 }
 0xfc9   : > { %4702 = vrcp.f32 %v3102_v41 }
 0xfcc   : > { %v3111_v55 = vpop.permute.xlu0 %3110 }
 0xfcd   : > { %4543 = vmatprep.subr.mxu1 %v3111_v55 }
 0xfce   : > { %4544 = vmatpush3.msra.mxu1 %v3111_v55 }
 0xfcf   : > { %4548 = vmatprep.subr.mxu1 %v5203_v20 }
 0xfd2   : > { %v4701_v27 = vpop.eup %4700 }
 0xfd3   : > { %v3109_v57 = vmul.f32 %v4701_v27, %v4695_v52  ;;  %v4735_v52 = vld [vmem:[#allocation2 + $0x18] sm:$0xff] }
 0xfd6   : > { %v4703_v56 = vpop.eup %4702 }
 0xfd7   : > { %v3108_v53 = vmul.f32 %v4703_v56, %v4697_v36 }
 0xfd9   : > { %4545 = vmatprep.mubr.msk.f32.mxu1 %vm1380_vm5, %v3108_v53 }
 0xfda   : > { %4546 = vmatmul.mubr.msk.f32.vlgmr.msra.gmra.mxu1 %vm1380_vm5, %v3109_v57 }
 0xfdb   : > { %4549 = vmatpush3.msra.mxu1 %v5203_v20  ;;  %v4533_v20 = vpop.f32.mrf.mxu1 }
 0xfdc   : > { %v2994_v11 = vadd.f32 %v4533_v20, %v5318_v12  ;;  %v4247_v20 = vld [vmem:[%s5520_s1] ss:$0 sm:$0xff]  ;;  %s5524_s1 = scalar_lea.vmem %s5489_s18, %s4869_s20 }
 0xfdd   : > { %v2988_v39 = vpop.f32.mrf.mxu1 }
 0xfde   : > { %v2989_v14 = vadd.f32 %v2988_v39, %v5320_v13 }
 0xff9   : > { %v3385_v15 = vpop.xlane.xlu1 %3384 }
 0xffd   : > { %v3396_v58 = vpop.permute.xlu1 %3395  ;;  %v3376_v60 = vpop.xlane.xlu0 %3375 }
 0xffe   : > { %v3378_v4 = vsub.f32 %v3368_v46, %v3376_v60  ;;  %4560 = vmatprep.subr.mxu1 %v3396_v58 }
0x1000   : > { %v3381_v61 = vmul.f32 1.442695, %v3378_v4 }
0x1002   : > { %4704 = vpow2.f32 %v3381_v61 }
0x1003   : > { %4706 = vrcp.f32 %v3385_v15 }
0x100f   : > { %v4705_v63 = vpop.eup %4704 }
0x1010   : > { %v3386_v0 = vsel %vm1380_vm5, %v4705_v63, 0.0  ;;  %v4707_v5 = vpop.eup %4706 }
0x1011   : > { %3387 = vadd.xlane.f32.xlu0 %v3386_v0  ;;  %v3391_v9 = vmul.f32 %v4707_v5, %v4699_v43 }
0x1027   : > { %3393 = vrot.lane.b32.xlu0 %v5145_v35, %s4756_s26  ;;  %s5522_s26 = scalar_lea.vmem %s5487_s16, %s4869_s20 }
0x102e   : > { %v3586_v13 = vpop.xlane.xlu1 %3585 }
0x102f   : > { %v3597_v31 = vmul.f32 0.03125, %v3586_v13 }
0x1031   : > { %v3601_v34 = vsub.f32 %v5340_v50, %v3597_v31  ;;  %v3658_v50 = vld [vmem:[%s4901_s7 + $0x8] sm:$0xff] }
0x1032   : > { %4576 = vmatprep.subr.mxu0 %v3658_v50 }
0x1033   : > { %v3605_v43 = vmul.f32 %v3601_v34, %v3601_v34  ;;  %4577 = vmatpush3.msra.mxu0 %v3658_v50 }
0x1034   : > { %4578 = vmatprep.subr.mxu0 %v3657_v51 }
0x1035   : > { %v3609_v47 = vsel %vm1175_vm2, %v3605_v43, 0.0  ;;  %4579 = vmatpush3.msra.mxu0 %v3657_v51 }
0x1046   : > { %3588 = vadd.xlane.f32.xlu0 %v3587_v38 }
0x109a   : > { %v4547_v6 = vpop.f32.mrf.mxu1  ;;  %v3388_v7 = vpop.xlane.xlu0 %3387 }
0x109b   : > { %4708 = vrcp.f32 %v3388_v7  ;;  %v4248_v7 = vld [vmem:[%s5521_s29] ss:$0 sm:$0xff] }
0x109c   : > { %v3188_v8 = vpop.f32.mrf.mxu1 }
0x109d   : > { %4550 = vmatprep.mubr.msk.f32.mxu1 %vm1294_vm4, %v3188_v8 }
0x109e   : > { %4551 = vmatmul.mubr.msk.f32.vlgmr.msra.gmra.mxu1 %vm1294_vm4, %v4547_v6  ;;  %v3394_v35 = vpop.permute.xlu0 %3393 }
0x109f   : > { %4561 = vmatpush3.msra.mxu1 %v3396_v58  ;;  %4564 = vmatprep.mubr.msk.f32.mxu1 %vm1380_vm5, %v3391_v9 }
0x10a0   : > { %4562 = vmatprep.subr.mxu1 %v3394_v35 }
0x10a1   : > { %4563 = vmatpush3.msra.mxu1 %v3394_v35 }
0x10a2   : > { %4567 = vmatprep.subr.mxu1 %v5232_v59 }
0x10a8   : > { %v4709_v62 = vpop.eup %4708 }
0x10a9   : > { %v3392_v10 = vmul.f32 %v4709_v62, %v4705_v63  ;;  %v3808_v62 = vld [vmem:[%s4911_s0 + $0x38] sm:$0xff] }
0x10ab   : > { %4565 = vmatmul.mubr.msk.f32.vlgmr.msra.gmra.mxu1 %vm1380_vm5, %v3392_v10  ;;  %v3807_v10 = vld [vmem:[%s4911_s0 + $0x30] sm:$0xff] }
0x10ac   : > { %4568 = vmatpush3.msra.mxu1 %v5232_v59 }
0x10ad   : > { %4586 = vmatprep.subr.mxu1 %v3808_v62 }
0x10cf   : > { %v3589_v24 = vpop.xlane.xlu0 %3588 }
0x10d0   : > { %v3598_v30 = vmul.f32 0.03125, %v3589_v24 }
0x10d2   : > { %v3602_v32 = vsub.f32 %v3579_v3, %v3598_v30 }
0x115e   : > { %v4552_v26 = vpop.f32.mrf.mxu1 }
0x115f   : > { %v3279_v16 = vadd.f32 %v4552_v26, %v2994_v11  ;;  %v3806_v11 = vld [vmem:[%s4911_s0 + $0x28] sm:$0xff]  ;;  %v3805_v26 = vld [vmem:[%s4911_s0 + $0x20] sm:$0xff] }
0x1160   : > { %v3269_v17 = vpop.f32.mrf.mxu1 }
0x1161   : > { %v3278_v18 = vadd.f32 %v3269_v17, %v2989_v14  ;;  %v3804_v14 = vld [vmem:[%s4911_s0 + $0x18] sm:$0xff]  ;;  %v3802_v17 = vld [vmem:[%s4911_s0 + $0x8] sm:$0xff] }
0x116b   : > { %v4566_v19 = vpop.f32.mrf.mxu1 }
0x116d   : > { %v3471_v44 = vpop.f32.mrf.mxu1 }
0x116e   : > { %4569 = vmatprep.mubr.msk.f32.mxu1 %vm1294_vm4, %v3471_v44 }
0x116f   : > { %4570 = vmatmul.mubr.msk.f32.vlgmr.msra.gmra.mxu1 %vm1294_vm4, %v4566_v19 }
0x1170   : > { %4587 = vmatpush3.msra.mxu1 %v3808_v62 }
0x1171   : > { %4588 = vmatprep.subr.mxu1 %v3807_v10 }
0x1172   : > { %4589 = vmatpush3.msra.mxu1 %v3807_v10 }
0x1173   : > { %4590 = vmatprep.subr.mxu1 %v3806_v11 }
0x1174   : > { %4591 = vmatpush3.msra.mxu1 %v3806_v11 }
0x1175   : > { %4592 = vmatprep.subr.mxu1 %v3805_v26 }
0x1176   : > { %4593 = vmatpush3.msra.mxu1 %v3805_v26 }
0x1177   : > { %4594 = vmatprep.subr.mxu1 %v3804_v14 }
0x1178   : > { %4595 = vmatpush3.msra.mxu1 %v3804_v14 }
0x122f   : > { %v4571_v40 = vpop.f32.mrf.mxu1 }
0x1230   : > { %v3562_v21 = vadd.f32 %v4571_v40, %v3279_v16  ;;  %v3803_v16 = vld [vmem:[%s4911_s0 + $0x10] sm:$0xff] }
0x1231   : > { %v3552_v22 = vpop.f32.mrf.mxu1  ;;  %4596 = vmatprep.subr.mxu1 %v3803_v16 }
0x1232   : > { %v3571_v23 = vadd.f32 %v5266_v25, %v3562_v21  ;;  %v3561_v59 = vadd.f32 %v3552_v22, %v3278_v18  ;;  %4597 = vmatpush3.msra.mxu1 %v3803_v16  ;;  %v3801_v18 = vld [vmem:[%s4911_s0] sm:$0xff] }
0x1233   : > { %4598 = vmatprep.subr.mxu1 %v3802_v17  ;;  %v4254_v16 = vld [vmem:[%s5522_s26] ss:$0 sm:$0xff] }
0x1234   : > { %3573 = vst.msk [vmem:[#allocation4 + $0x18] sm:$0xff] %vm1175_vm2, %v3571_v23  ;;  %v3570_v12 = vadd.f32 %v5266_v25, %v3561_v59  ;;  %v3606_v25 = vmul.f32 %v3602_v32, %v3602_v32  ;;  %4599 = vmatpush3.msra.mxu1 %v3802_v17 }
0x1235   : > { %4600 = vmatprep.subr.mxu1 %v3801_v18 }
0x1236   : > { %3572 = vst.msk [vmem:[#allocation4 + $0x10] sm:$0xff] %vm1175_vm2, %v3570_v12  ;;  %v3612_v46 = vsel %vm1175_vm2, %v3606_v25, 0.0  ;;  %4601 = vmatpush3.msra.mxu1 %v3801_v18 }
0x123b   : > { %v3577_v33 = vld [vmem:[#allocation4 + $0x18] sm:$0xff] }
0x123c   : > { %v3581_v45 = vadd.f32 %v4735_v52, %v3577_v33 }
0x123d   : > { %v3576_v36 = vld [vmem:[#allocation4 + $0x10] sm:$0xff] }
0x123e   : > { %v3593_v29 = vsel %vm1175_vm2, %v3581_v45, 0.0  ;;  %v3580_v28 = vadd.f32 %v4736_v37, %v3576_v36 }
0x123f   : > { %3594 = vadd.xlane.f32.xlu0 %v3593_v29 }
0x1240   : > { %v3590_v42 = vsel %vm1175_vm2, %v3580_v28, 0.0 }
0x1241   : > { %3591 = vadd.xlane.f32.xlu1 %v3590_v42 }
0x1243   : > { %3613 = vadd.xlane.f32.xlu0 %v3612_v46 }
0x1245   : > { %3610 = vadd.xlane.f32.xlu1 %v3609_v47 }
0x12c8   : > { %v3595_v54 = vpop.xlane.xlu0 %3594 }
0x12c9   : > { %v3600_v41 = vmul.f32 0.03125, %v3595_v54 }
0x12ca   : > { %v3592_v55 = vpop.xlane.xlu1 %3591 }
0x12cb   : > { %v3604_v27 = vsub.f32 %v3581_v45, %v3600_v41  ;;  %v3599_v56 = vmul.f32 0.03125, %v3592_v55 }
0x12cc   : > { %v3614_v53 = vpop.xlane.xlu0 %3613 }
0x12cd   : > { %v3603_v57 = vsub.f32 %v3580_v28, %v3599_v56  ;;  %v3622_v15 = vmul.f32 0.03125, %v3614_v53  ;;  %v3608_v58 = vmul.f32 %v3604_v27, %v3604_v27 }
0x12ce   : > { %v3611_v60 = vpop.xlane.xlu1 %3610 }
0x12cf   : > { %v3626_v4 = vadd.f32 1e-05, %v3622_v15  ;;  %v3621_v61 = vmul.f32 0.03125, %v3611_v60  ;;  %v3618_v63 = vsel %vm1175_vm2, %v3608_v58, 0.0  ;;  %v3607_v0 = vmul.f32 %v3603_v57, %v3603_v57 }
0x12d0   : > { %3619 = vadd.xlane.f32.xlu0 %v3618_v63 }
0x12d1   : > { %4710 = vrsqrt.f32 %v3626_v4  ;;  %v3625_v1 = vadd.f32 1e-05, %v3621_v61  ;;  %v3615_v2 = vsel %vm1175_vm2, %v3607_v0, 0.0 }
0x12d2   : > { %3616 = vadd.xlane.f32.xlu1 %v3615_v2 }
0x12d3   : > { %4712 = vrsqrt.f32 %v3625_v1 }
0x12de   : > { %v4711_v3 = vpop.eup %4710 }
0x12df   : > { %v3634_v38 = vmul.f32 %v4711_v3, %v3602_v32 }
0x12e0   : > { %v4713_v39 = vpop.eup %4712 }
0x12e1   : > { %v3633_v5 = vmul.f32 %v4713_v39, %v3601_v34  ;;  %v3644_v6 = vmul.f32 %v4247_v20, %v3634_v38  ;;  %v4249_v34 = vld [vmem:[%s745_s9] ss:$0 sm:$0xff] }
0x12e3   : > { %v3643_v8 = vmul.f32 %v4247_v20, %v3633_v5  ;;  %v5389_v35 = vadd.f32 %v4248_v7, %v3644_v6 }
0x12e5   : > { %v5387_v9 = vadd.f32 %v4248_v7, %v3643_v8 }
0x12e7   : > { %4580 = vmatprep.mubr.msk.f32.mxu0 %vm1175_vm2, %v5387_v9 }
0x12e8   : > { %4581 = vmatmul.mubr.msk.f32.vlgmr.msra.gmra.mxu0 %vm1175_vm2, %v5389_v35 }
0x1359   : > { %v3620_v19 = vpop.xlane.xlu0 %3619 }
0x135a   : > { %v3624_v44 = vmul.f32 0.03125, %v3620_v19 }
0x135b   : > { %v3617_v40 = vpop.xlane.xlu1 %3616 }
0x135c   : > { %v3628_v21 = vadd.f32 1e-05, %v3624_v44  ;;  %v3623_v22 = vmul.f32 0.03125, %v3617_v40 }
0x135e   : > { %4714 = vrsqrt.f32 %v3628_v21  ;;  %v3627_v23 = vadd.f32 1e-05, %v3623_v22 }
0x1360   : > { %4716 = vrsqrt.f32 %v3627_v23 }
0x136b   : > { %v4715_v59 = vpop.eup %4714 }
0x136c   : > { %v3636_v24 = vmul.f32 %v4715_v59, %v3604_v27 }
0x136d   : > { %v4717_v12 = vpop.eup %4716 }
0x136e   : > { %v3635_v13 = vmul.f32 %v4717_v12, %v3603_v57  ;;  %v3646_v30 = vmul.f32 %v4247_v20, %v3636_v24 }
0x1370   : > { %v3645_v31 = vmul.f32 %v4247_v20, %v3635_v13  ;;  %v5405_v33 = vadd.f32 %v4248_v7, %v3646_v30 }
0x1372   : > { %v5403_v32 = vadd.f32 %v4248_v7, %v3645_v31 }
0x1374   : > { %4583 = vmatprep.mubr.msk.f32.mxu0 %vm1175_vm2, %v5403_v32 }
0x1375   : > { %4584 = vmatmul.mubr.msk.f32.gmra.mxu0 %vm1175_vm2, %v5405_v33 }
0x13a8   : > { %v4582_v52 = vpop.f32.mrf.mxu0 }
0x13a9   : > { %v3752_v45 = vadd.f32 %v4582_v52, %v4249_v34 }
0x13aa   : > { %v3746_v36 = vpop.f32.mrf.mxu0 }
0x13ab   : > { %v3770_v29 = vmul.f32 0.044715, %v3752_v45  ;;  %v3747_v37 = vadd.f32 %v4249_v34, %v3746_v36  ;;  %v3766_v56 = vmul.f32 0.5, %v3752_v45 }
0x13ad   : > { %v3774_v28 = vmul.f32 %v3770_v29, %v3752_v45  ;;  %v3769_v25 = vmul.f32 0.044715, %v3747_v37  ;;  %v3765_v55 = vmul.f32 0.5, %v3747_v37 }
0x13af   : > { %v3778_v42 = vmul.f32 %v3774_v28, %v3752_v45  ;;  %v3773_v43 = vmul.f32 %v3769_v25, %v3747_v37 }
0x13b1   : > { %v3782_v46 = vadd.f32 %v3778_v42, %v3752_v45  ;;  %v3777_v47 = vmul.f32 %v3773_v43, %v3747_v37 }
0x13b3   : > { %v3786_v48 = vmul.f32 0.7978846, %v3782_v46  ;;  %v3781_v49 = vadd.f32 %v3777_v47, %v3747_v37 }
0x13b5   : > { %4718 = vtanh.f32 %v3786_v48  ;;  %v3785_v50 = vmul.f32 0.7978846, %v3781_v49 }
0x13b7   : > { %4720 = vtanh.f32 %v3785_v50 }
0x13c2   : > { %v4719_v51 = vpop.eup %4718 }
0x13c3   : > { %v3794_v41 = vadd.f32 1.0, %v4719_v51 }
0x13c4   : > { %v4721_v54 = vpop.eup %4720 }
0x13c5   : > { %v3793_v27 = vadd.f32 1.0, %v4721_v54  ;;  %v3798_v57 = vmul.f32 %v3794_v41, %v3766_v56 }
0x13c7   : > { %v3797_v53 = vmul.f32 %v3793_v27, %v3765_v55 }
0x13c9   : > { %4602 = vmatprep.mubr.msk.f32.mxu1 %vm3816_vm6, %v3797_v53 }
0x13ca   : > { %4603 = vmatmul.mubr.msk.f32.vlgmr.msra.gmra.mxu1 %vm3816_vm6, %v3798_v57 }
0x1435   : > { %v4585_v15 = vpop.f32.mrf.mxu0 }
0x1436   : > { %v3762_v58 = vadd.f32 %v4585_v15, %v4249_v34 }
0x1437   : > { %v3756_v60 = vpop.f32.mrf.mxu0 }
0x1438   : > { %v3772_v4 = vmul.f32 0.044715, %v3762_v58  ;;  %v3757_v61 = vadd.f32 %v4249_v34, %v3756_v60  ;;  %v3768_v11 = vmul.f32 0.5, %v3762_v58  ;;  %v4259_v60 = vld [vmem:[%s5523_s22] ss:$0 sm:$0xff] }
0x143a   : > { %v3776_v63 = vmul.f32 %v3772_v4, %v3762_v58  ;;  %v3771_v0 = vmul.f32 0.044715, %v3757_v61  ;;  %v3767_v62 = vmul.f32 0.5, %v3757_v61 }
0x143c   : > { %v3780_v1 = vmul.f32 %v3776_v63, %v3762_v58  ;;  %v3775_v2 = vmul.f32 %v3771_v0, %v3757_v61  ;;  %v4260_v63 = vld [vmem:[%s5524_s1] ss:$0 sm:$0xff] }
0x143e   : > { %v3784_v3 = vadd.f32 %v3780_v1, %v3762_v58  ;;  %v3779_v38 = vmul.f32 %v3775_v2, %v3757_v61 }
0x1440   : > { %v3783_v20 = vadd.f32 %v3779_v38, %v3757_v61  ;;  %v3788_v39 = vmul.f32 0.7978846, %v3784_v3 }
0x1442   : > { %v3787_v5 = vmul.f32 0.7978846, %v3783_v20  ;;  %4722 = vtanh.f32 %v3788_v39 }
0x1444   : > { %4724 = vtanh.f32 %v3787_v5 }
0x144f   : > { %v4723_v6 = vpop.eup %4722 }
0x1450   : > { %v3796_v8 = vadd.f32 1.0, %v4723_v6 }
0x1451   : > { %v4725_v7 = vpop.eup %4724 }
0x1452   : > { %v3795_v10 = vadd.f32 1.0, %v4725_v7  ;;  %v3800_v14 = vmul.f32 %v3796_v8, %v3768_v11 }
0x1454   : > { %v3799_v26 = vmul.f32 %v3795_v10, %v3767_v62 }
0x1456   : > { %4605 = vmatprep.mubr.msk.f32.mxu1 %vm3816_vm6, %v3799_v26 }
0x1457   : > { %4606 = vmatmul.mubr.msk.f32.gmra.mxu1 %vm3816_vm6, %v3800_v14 }
0x148a   : > { %v4604_v17 = vpop.f32.mrf.mxu1 }
0x148b   : > { %v3901_v18 = vadd.f32 %v4604_v17, %v4254_v16 }
0x148c   : > { %v3895_v19 = vpop.f32.mrf.mxu1 }
0x148d   : > { %v3896_v44 = vadd.f32 %v4254_v16, %v3895_v19  ;;  %v3915_v40 = vadd.f32 %v3901_v18, %v5389_v35 }
0x148f   : > { %v3923_v21 = vsel %vm1175_vm2, %v3915_v40, 0.0  ;;  %v3914_v22 = vadd.f32 %v3896_v44, %v5387_v9 }
0x1490   : > { %3924 = vadd.xlane.f32.xlu0 %v3923_v21 }
0x1491   : > { %v3920_v23 = vsel %vm1175_vm2, %v3914_v22, 0.0 }
0x1492   : > { %3921 = vadd.xlane.f32.xlu1 %v3920_v23 }
0x1517   : > { %v4607_v59 = vpop.f32.mrf.mxu1 }
0x1518   : > { %v3911_v24 = vadd.f32 %v4607_v59, %v4254_v16 }
0x1519   : > { %v3905_v12 = vpop.f32.mrf.mxu1  ;;  %v3925_v13 = vpop.xlane.xlu0 %3924 }
0x151a   : > { %v3906_v30 = vadd.f32 %v4254_v16, %v3905_v12  ;;  %v3933_v31 = vmul.f32 0.03125, %v3925_v13  ;;  %v3917_v34 = vadd.f32 %v3911_v24, %v5405_v33 }
0x151b   : > { %v3922_v52 = vpop.xlane.xlu1 %3921 }
0x151c   : > { %v3937_v45 = vsub.f32 %v3915_v40, %v3933_v31  ;;  %v3932_v36 = vmul.f32 0.03125, %v3922_v52  ;;  %v3929_v35 = vsel %vm1175_vm2, %v3917_v34, 0.0  ;;  %v3916_v29 = vadd.f32 %v3906_v30, %v5403_v32 }
0x151d   : > { %3930 = vadd.xlane.f32.xlu0 %v3929_v35 }
0x151e   : > { %v3936_v9 = vsub.f32 %v3914_v22, %v3932_v36  ;;  %v3926_v37 = vsel %vm1175_vm2, %v3916_v29, 0.0  ;;  %v3941_v28 = vmul.f32 %v3937_v45, %v3937_v45 }
0x151f   : > { %3927 = vadd.xlane.f32.xlu1 %v3926_v37 }
0x1520   : > { %v3947_v25 = vsel %vm1175_vm2, %v3941_v28, 0.0  ;;  %v3940_v42 = vmul.f32 %v3936_v9, %v3936_v9 }
0x1521   : > { %3948 = vadd.xlane.f32.xlu0 %v3947_v25 }
0x1522   : > { %v3944_v43 = vsel %vm1175_vm2, %v3940_v42, 0.0 }
0x1523   : > { %3945 = vadd.xlane.f32.xlu1 %v3944_v43 }
0x15a6   : > { %v3931_v33 = vpop.xlane.xlu0 %3930 }
0x15a7   : > { %v3935_v46 = vmul.f32 0.03125, %v3931_v33 }
0x15a8   : > { %v3928_v47 = vpop.xlane.xlu1 %3927 }
0x15a9   : > { %v3939_v48 = vsub.f32 %v3917_v34, %v3935_v46  ;;  %v3934_v49 = vmul.f32 0.03125, %v3928_v47 }
0x15aa   : > { %v3949_v50 = vpop.xlane.xlu0 %3948 }
0x15ab   : > { %v3938_v32 = vsub.f32 %v3916_v29, %v3934_v49  ;;  %v3957_v51 = vmul.f32 0.03125, %v3949_v50  ;;  %v3943_v54 = vmul.f32 %v3939_v48, %v3939_v48 }
0x15ac   : > { %v3946_v41 = vpop.xlane.xlu1 %3945 }
0x15ad   : > { %v3961_v55 = vadd.f32 1e-05, %v3957_v51  ;;  %v3956_v27 = vmul.f32 0.03125, %v3946_v41  ;;  %v3953_v56 = vsel %vm1175_vm2, %v3943_v54, 0.0  ;;  %v3942_v53 = vmul.f32 %v3938_v32, %v3938_v32 }
0x15ae   : > { %3954 = vadd.xlane.f32.xlu0 %v3953_v56 }
0x15af   : > { %4726 = vrsqrt.f32 %v3961_v55  ;;  %v3960_v57 = vadd.f32 1e-05, %v3956_v27  ;;  %v3950_v15 = vsel %vm1175_vm2, %v3942_v53, 0.0 }
0x15b0   : > { %3951 = vadd.xlane.f32.xlu1 %v3950_v15 }
0x15b1   : > { %4728 = vrsqrt.f32 %v3960_v57 }
0x15bc   : > { %v4727_v58 = vpop.eup %4726 }
0x15bd   : > { %v3969_v4 = vmul.f32 %v4727_v58, %v3937_v45 }
0x15be   : > { %v4729_v61 = vpop.eup %4728 }
0x15bf   : > { %v3979_v0 = vmul.f32 %v4259_v60, %v3969_v4  ;;  %v3968_v1 = vmul.f32 %v4729_v61, %v3936_v9 }
0x15c1   : > { %v3989_v2 = vadd.f32 %v4260_v63, %v3979_v0  ;;  %v3978_v3 = vmul.f32 %v4259_v60, %v3968_v1 }
0x15c3   : > { %3993 = vst.msk [vmem:[#allocation2 + $0x8] sm:$0xff] %vm1175_vm2, %v3989_v2  ;;  %v3988_v38 = vadd.f32 %v4260_v63, %v3978_v3 }
0x15c5   : > { %3992 = vst.msk [vmem:[#allocation2] sm:$0xff] %vm1175_vm2, %v3988_v38 }
0x1637   : > { %v3955_v20 = vpop.xlane.xlu0 %3954 }
0x1638   : > { %v3959_v39 = vmul.f32 0.03125, %v3955_v20 }
0x1639   : > { %v3952_v5 = vpop.xlane.xlu1 %3951 }
0x163a   : > { %v3963_v6 = vadd.f32 1e-05, %v3959_v39  ;;  %v3958_v7 = vmul.f32 0.03125, %v3952_v5 }
0x163c   : > { %4730 = vrsqrt.f32 %v3963_v6  ;;  %v3962_v8 = vadd.f32 1e-05, %v3958_v7 }
0x163e   : > { %4732 = vrsqrt.f32 %v3962_v8 }
0x1649   : > { %v4731_v62 = vpop.eup %4730 }
0x164a   : > { %v3971_v10 = vmul.f32 %v4731_v62, %v3939_v48 }
0x164b   : > { %v4733_v11 = vpop.eup %4732 }
0x164c   : > { %v3981_v26 = vmul.f32 %v4259_v60, %v3971_v10  ;;  %v3970_v14 = vmul.f32 %v4733_v11, %v3938_v32 }
0x164e   : > { %v3991_v16 = vadd.f32 %v4260_v63, %v3981_v26  ;;  %v3980_v17 = vmul.f32 %v4259_v60, %v3970_v14  ;;  %3999 = sbr.rel (%p4261_p5) target bundleno = 5717 (0x1655), region = 104 }
0x1650   : > { %3995 = vst.msk [vmem:[#allocation2 + $0x18] sm:$0xff] %vm1175_vm2, %v3991_v16  ;;  %v3990_v18 = vadd.f32 %v4260_v63, %v3980_v17 }
0x1652   : > { %3994 = vst.msk [vmem:[#allocation2 + $0x10] sm:$0xff] %vm1175_vm2, %v3990_v18 }
0x1653   : > { %4000 = vst.msk [vmem:[%s5525_s27] sm:$0xff] %vm1175_vm2, %v3988_v38  ;;  %4001 = vst.msk [vmem:[%s5525_s27 + $0x8] sm:$0xff] %vm1175_vm2, %v3989_v2 }
0x1654   : > { %4002 = vst.msk [vmem:[%s5525_s27 + $0x10] sm:$0xff] %vm1175_vm2, %v3990_v18  ;;  %4003 = vst.msk [vmem:[%s5525_s27 + $0x18] sm:$0xff] %vm1175_vm2, %v3991_v16 }
0x1655 PF: > { %s5526_s30 = sld [smem:[#allocation6_spill]] }
0x165b   : > { %s29_s0 = sadd.s32 1, %s5526_s30  }
0x165c   : > { %p26_p6 = scmp.ge.s32.totalorder %s29_s0, 4  }
0x165e   :  { %28 = sbr.rel (!%p26_p6) target bundleno = 10 (0xa), region = 168 }

</bundles_post_ra>
